<compile_context>
chip_gen: v6e
topology: v6e:2x2x1
jax: 0.10.0
libtpu: 0.0.40
codegen_flags: <defaults>
</compile_context>

<pallas_src>
import functools

import jax
import jax.numpy as jnp
from jax.experimental import pallas as pl
from jax.experimental.pallas import tpu as pltpu


def _fused_kernel(x_ref, w_ref, t_ref, o_ref, *, H, W, Cout):
    """One grid step: single matmul conv + folded-BN bias + MaxPool(2,2) + ReLU.

    x_ref: (Nb, H, KH*Wp*Cin)        K-stacked, lane-folded, padded input slab (bf16)
    w_ref: (KH*Wp*Cin, W*Cout)       stacked banded weights with BN scale folded in (bf16)
    t_ref: (1, W*Cout)               folded shift: conv bias + BN beta/mean, tiled along W (f32)
    o_ref: (Nb, H//2, (W//2)*Cout)   pooled output, lane-dense
    """
    Nb = x_ref.shape[0]
    K = x_ref.shape[2]
    WC = W * Cout
    Hh, Wh = H // 2, W // 2

    # Single MXU matmul: M = Nb*H rows, contraction depth K = KH*Wp*Cin, f32 accumulation.
    slab = x_ref[...].reshape(Nb * H, K)
    y = jnp.dot(slab, w_ref[...], preferred_element_type=jnp.float32)      # (Nb*H, W*Cout)
    y = y + t_ref[...]                       # folded conv-bias + BN shift (scale is in weights)

    # MaxPool(2,2): cheap H (sublane) max first halves the rows fed to the lane-heavy W pool.
    y = y.reshape(Nb, Hh, 2, WC)
    ph = jnp.maximum(y[:, :, 0, :], y[:, :, 1, :])                          # (Nb, Hh, W*Cout)
    pr = ph.reshape(Nb, Hh, Wh, 2 * Cout)
    pw = jnp.maximum(pr[..., :Cout], pr[..., Cout:])                        # (Nb, Hh, Wh, Cout)
    # ReLU last (commutes with max); 512-lane (multiple of 128) unmasked store.
    o_ref[...] = jnp.maximum(pw.reshape(Nb, Hh, Wh * Cout), 0.0).astype(o_ref.dtype)


def _vmem_capacity_bytes():
    try:
        return int(pltpu.get_tpu_info().vmem_capacity_bytes)
    except Exception:
        return 64 * 1024 * 1024            # v7x per-core capacity: safe floor for all gens


def _per_step_vmem_bytes(block_n, *, H, W, Cout, K, out_bytes):
    wc = W * Cout
    in_blk = block_n * H * K * 2                                   # bf16 stacked input block
    w_blk = K * wc * 2                                             # bf16 banded weights
    bias_blk = wc * 4
    out_blk = block_n * (H // 2) * (W // 2) * Cout * out_bytes
    tmp = block_n * H * (wc * 4 + wc * 2)                          # f32 conv plane + pool temps
    return 2 * (in_blk + w_blk + bias_blk + out_blk) + tmp         # x2: double-buffered pipeline


def _pick_block_n(N, H, *, bytes_for, budget):
    """Largest batch block that fits the VMEM budget; split to 2 'parallel' steps only if
    each step still keeps MXU rows M = block_n*H >= 256 (v7x has 2 TCs; v5e/v6e have 1)."""
    divisors = [d for d in range(N, 0, -1) if N % d == 0]
    fit = next((d for d in divisors if bytes_for(d) <= budget), 1)
    if fit == N and N >= 2:
        half = next((d for d in divisors if d < N), 1)
        if half * H >= 256:
            return half
    return fit


def maxpool_conv_bn_relu(x_nchw, weight, conv_bias, gamma, beta,
                         running_mean, running_var, eps=1e-5,
                         *, padding=1, compute_dtype=jnp.bfloat16,
                         out_dtype=jnp.float32, block_n=None):
    """PyTorch-equivalent forward: MaxPool2d(2,2)(ReLU(BN(Conv2d(x)))). NCHW in, NCHW out."""
    N, Cin, H, W = x_nchw.shape
    Cout, Cin_w, KH, KW = weight.shape
    assert Cin_w == Cin
    assert 2 * padding == KH - 1 and 2 * padding == KW - 1, "wrapper assumes 'same' conv output"
    assert H % 2 == 0 and W % 2 == 0
    Hp, Wp = H + 2 * padding, W + 2 * padding
    Hh, Wh = H // 2, W // 2
    K = KH * Wp * Cin

    # ---- layout plumbing (plain JAX, fused by XLA): NCHW -> padded, lane-folded, K-stacked ----
    x = jnp.transpose(x_nchw, (0, 2, 3, 1)).astype(jnp.float32)             # NCHW -> NHWC
    x = jnp.pad(x, ((0, 0), (padding, padding), (padding, padding), (0, 0)))
    xf = x.reshape(N, Hp, Wp * Cin)                                         # fold (W, Cin) -> lanes
    # Stack the KH shifted sublane windows along the contraction axis: K index =
    # dy*(Wp*Cin) + p*Cin + ci holds x_padded[n, h+dy, p, ci] for output row h.
    x_stk = jnp.concatenate([xf[:, dy:dy + H, :] for dy in range(KH)], axis=-1)
    x_stk = x_stk.astype(compute_dtype)                                     # (N, H, KH*Wp*Cin)

    # ---- stacked banded weights with BN scale folded in (f32), single bf16 cast ----
    # B[dy*Wp*Cin + (w+dx)*Cin + ci, w*Cout + co] = W_hwio[dy, dx, ci, co] * scale[co]
    scale = (gamma / jnp.sqrt(running_var + eps)).astype(jnp.float32)       # (Cout,)
    w_hwio = jnp.transpose(weight, (2, 3, 1, 0)).astype(jnp.float32)        # OIHW -> HWIO
    w_scaled = w_hwio * scale[None, None, None, :]
    bands = []
    for dy in range(KH):
        b4 = jnp.zeros((Wp, Cin, W, Cout), jnp.float32)
        for dx in range(KW):
            eye = jnp.eye(Wp, W, k=-dx, dtype=jnp.float32)                  # eye[w+dx, w] = 1
            b4 = b4 + jnp.einsum("pw,io->piwo", eye, w_scaled[dy, dx])
        bands.append(b4.reshape(Wp * Cin, W * Cout))
    bmat = jnp.concatenate(bands, axis=0).astype(compute_dtype)             # (K, W*Cout)

    # ---- folded shift: conv bias + BN beta / running mean, tiled along W (lane-folded) ----
    bias = (beta + (conv_bias - running_mean) * scale).astype(jnp.float32)  # (Cout,)
    bias_f = jnp.tile(bias, W).reshape(1, W * Cout)

    # ---- batch blocking from a VMEM budget (v5e/v6e 128 MiB vs v7x 64 MiB) ----
    out_bytes = jnp.dtype(out_dtype).itemsize
    vmem_cap = _vmem_capacity_bytes()
    budget = int(vmem_cap * 0.70)
    bytes_for = functools.partial(_per_step_vmem_bytes, H=H, W=W, Cout=Cout, K=K,
                                  out_bytes=out_bytes)
    if block_n is None:
        block_n = _pick_block_n(N, H, bytes_for=bytes_for, budget=budget)
    assert N % block_n == 0
    grid = (N // block_n,)

    need = bytes_for(block_n)
    vmem_limit = max(32 * 1024 * 1024, min(2 * need, budget))
    vmem_limit = int(max(vmem_limit, need + (2 << 20)))

    kernel = functools.partial(_fused_kernel, H=H, W=W, Cout=Cout)

    out_folded = pl.pallas_call(
        kernel,
        out_shape=jax.ShapeDtypeStruct((N, Hh, Wh * Cout), out_dtype),
        grid_spec=pltpu.PrefetchScalarGridSpec(
            num_scalar_prefetch=0,
            grid=grid,
            in_specs=[
                pl.BlockSpec((block_n, H, K), lambda n: (n, 0, 0)),
                pl.BlockSpec((K, W * Cout), lambda n: (0, 0)),
                pl.BlockSpec((1, W * Cout), lambda n: (0, 0)),
            ],
            out_specs=pl.BlockSpec((block_n, Hh, Wh * Cout), lambda n: (n, 0, 0)),
        ),
        compiler_params=pltpu.CompilerParams(
            dimension_semantics=("parallel",),      # 2-TC sharding on v7x; no-op cost on 1-TC gens
            vmem_limit_bytes=vmem_limit,
        ),
    )(x_stk, bmat, bias_f)

    out = out_folded.reshape(N, Hh, Wh, Cout)
    return jnp.transpose(out, (0, 3, 1, 2)).astype(out_dtype)               # NHWC -> NCHW


if __name__ == "__main__":
    key = jax.random.PRNGKey(0)
    N, Cin, H, W = 2, 4, 16, 16
    Cout, Kk = 64, 3

    k1, k2, k3, k4, k5, k6, k7 = jax.random.split(key, 7)
    x = jax.random.normal(k1, (N, Cin, H, W), dtype=jnp.float32)

    # Conv2d params (PyTorch-style uniform(-1/sqrt(fan_in), 1/sqrt(fan_in))).
    fan_in = Cin * Kk * Kk
    bound = 1.0 / (fan_in ** 0.5)
    weight = jax.random.uniform(k2, (Cout, Cin, Kk, Kk), minval=-bound, maxval=bound,
                                dtype=jnp.float32)
    conv_bias = jax.random.uniform(k3, (Cout,), minval=-bound, maxval=bound,
                                   dtype=jnp.float32)

    # Non-trivial eval-mode BatchNorm2d(affine) stats; mixed-sign gamma exercises
    # the affine-before-max ordering.
    gamma = jax.random.uniform(k4, (Cout,), minval=-1.5, maxval=1.5, dtype=jnp.float32)
    beta = jax.random.normal(k5, (Cout,), dtype=jnp.float32) * 0.3
    running_mean = jax.random.normal(k6, (Cout,), dtype=jnp.float32) * 0.3
    running_var = jax.random.uniform(k7, (Cout,), minval=0.5, maxval=1.5, dtype=jnp.float32)
    eps = 1e-5

    out = maxpool_conv_bn_relu(x, weight, conv_bias, gamma, beta,
                               running_mean, running_var, eps)
    out = jax.block_until_ready(out)
    assert out.shape == (N, Cout, H // 2, W // 2), out.shape

    # Pure-JAX f32 reference (module semantics). The input is quantized to bf16 like the
    # kernel operand; weights stay f32 so the check covers the BN-scale-into-weights fold.
    xq = x.astype(jnp.bfloat16).astype(jnp.float32)
    conv = jax.lax.conv_general_dilated(
        xq, weight, window_strides=(1, 1), padding=((1, 1), (1, 1)),
        dimension_numbers=("NCHW", "OIHW", "NCHW"),
        preferred_element_type=jnp.float32)
    conv = conv + conv_bias[None, :, None, None]
    bn = (conv - running_mean[None, :, None, None]) / jnp.sqrt(
        running_var[None, :, None, None] + eps)
    bn = bn * gamma[None, :, None, None] + beta[None, :, None, None]
    act = jnp.maximum(bn, 0.0)
    ref = act.reshape(N, Cout, H // 2, 2, W // 2, 2).max(axis=(3, 5))

    err = float(jnp.max(jnp.abs(out - ref) / (1.0 + jnp.abs(ref))))
    assert err < 2e-2, f"max rel-ish err {err}"

    print("KERNEL_OK")
</pallas_src>

<mosaic_0001>
module attributes {stable_mosaic.version = 11 : i64} {
  func.func @_fused_kernel(%arg0: i32, %arg1: memref<2x16x216xbf16, #tpu.memory_space<vmem>>, %arg2: memref<216x1024xbf16, #tpu.memory_space<vmem>>, %arg3: memref<1x1024xf32, #tpu.memory_space<vmem>>, %arg4: memref<2x8x512xf32, #tpu.memory_space<vmem>>) attributes {dimension_semantics = [#tpu.dimension_semantics<parallel>], iteration_bounds = array<i64: 1>, scalar_prefetch = 0 : i64, scratch_operands = 0 : i64, tpu.core_type = #tpu.core_type<tc>, window_params = [{transform_indices = @transform_0, window_bounds = array<i64: 2, 16, 216>}, {pipeline_mode = #tpu.pipeline_mode<synchronous>, transform_indices = @transform_1, window_bounds = array<i64: 216, 1024>}, {pipeline_mode = #tpu.pipeline_mode<synchronous>, transform_indices = @transform_2, window_bounds = array<i64: 1, 1024>}, {transform_indices = @transform_3, window_bounds = array<i64: 2, 8, 512>}]} {
    %c0 = arith.constant 0 : index
    %c0_0 = arith.constant 0 : index
    %c0_1 = arith.constant 0 : index
    %0 = vector.load %arg1[%c0, %c0_0, %c0_1] : memref<2x16x216xbf16, #tpu.memory_space<vmem>>, vector<2x16x216xbf16>
    %1 = vector.shape_cast %0 : vector<2x16x216xbf16> to vector<32x216xbf16>
    %c0_2 = arith.constant 0 : index
    %c0_3 = arith.constant 0 : index
    %2 = vector.load %arg2[%c0_2, %c0_3] : memref<216x1024xbf16, #tpu.memory_space<vmem>>, vector<216x1024xbf16>
    %cst = arith.constant dense<0.000000e+00> : vector<32x1024xf32>
    %3 = tpu.matmul %1, %2, %cst {dimension_numbers = #tpu.dot_dimension_numbers<[1], [0], [0], [1], [0, 0, 1, 1], [], []>} : vector<32x216xbf16>, vector<216x1024xbf16>, vector<32x1024xf32> -> vector<32x1024xf32>
    %c0_4 = arith.constant 0 : index
    %c0_5 = arith.constant 0 : index
    %4 = vector.load %arg3[%c0_4, %c0_5] : memref<1x1024xf32, #tpu.memory_space<vmem>>, vector<1x1024xf32>
    %5 = vector.broadcast %4 : vector<1x1024xf32> to vector<32x1024xf32>
    %6 = arith.addf %3, %5 : vector<32x1024xf32>
    %7 = vector.shape_cast %6 : vector<32x1024xf32> to vector<2x8x2x1024xf32>
    %8 = vector.extract_strided_slice %7 {offsets = [0, 0, 0, 0], sizes = [2, 8, 1, 1024], strides = [1, 1, 1, 1]} : vector<2x8x2x1024xf32> to vector<2x8x1x1024xf32>
    %9 = vector.shape_cast %8 : vector<2x8x1x1024xf32> to vector<2x8x1024xf32>
    %10 = vector.extract_strided_slice %7 {offsets = [0, 0, 1, 0], sizes = [2, 8, 1, 1024], strides = [1, 1, 1, 1]} : vector<2x8x2x1024xf32> to vector<2x8x1x1024xf32>
    %11 = vector.shape_cast %10 : vector<2x8x1x1024xf32> to vector<2x8x1024xf32>
    %12 = arith.maximumf %9, %11 : vector<2x8x1024xf32>
    %13 = vector.shape_cast %12 : vector<2x8x1024xf32> to vector<2x8x8x128xf32>
    %14 = vector.extract_strided_slice %13 {offsets = [0, 0, 0, 0], sizes = [2, 8, 8, 64], strides = [1, 1, 1, 1]} : vector<2x8x8x128xf32> to vector<2x8x8x64xf32>
    %15 = vector.extract_strided_slice %13 {offsets = [0, 0, 0, 64], sizes = [2, 8, 8, 64], strides = [1, 1, 1, 1]} : vector<2x8x8x128xf32> to vector<2x8x8x64xf32>
    %16 = arith.maximumf %14, %15 : vector<2x8x8x64xf32>
    %17 = vector.shape_cast %16 : vector<2x8x8x64xf32> to vector<2x8x512xf32>
    %cst_6 = arith.constant 0.000000e+00 : f32
    %18 = vector.broadcast %cst_6 : f32 to vector<2x8x512xf32>
    %19 = arith.maximumf %17, %18 : vector<2x8x512xf32>
    %c0_7 = arith.constant 0 : index
    %c0_8 = arith.constant 0 : index
    %c0_9 = arith.constant 0 : index
    %20 = vector.load %arg4[%c0_7, %c0_8, %c0_9] : memref<2x8x512xf32, #tpu.memory_space<vmem>>, vector<2x8x512xf32>
    tpu.vector_store %arg4[%c0_7, %c0_8, %c0_9], %19 {strides = array<i32>} : memref<2x8x512xf32, #tpu.memory_space<vmem>>, vector<2x8x512xf32>,
    return
  }
  func.func @transform_0(%arg0: i32) -> (i32, i32, i32) {
    %c0_i32 = arith.constant 0 : i32
    %c0_i32_0 = arith.constant 0 : i32
    %c0_i32_1 = arith.constant 0 : i32
    return %arg0, %c0_i32, %c0_i32_0 : i32, i32, i32
  }
  func.func @transform_1(%arg0: i32) -> (i32, i32) {
    %c0_i32 = arith.constant 0 : i32
    %c0_i32_0 = arith.constant 0 : i32
    %c0_i32_1 = arith.constant 0 : i32
    return %c0_i32, %c0_i32_0 : i32, i32
  }
  func.func @transform_2(%arg0: i32) -> (i32, i32) {
    %c0_i32 = arith.constant 0 : i32
    %c0_i32_0 = arith.constant 0 : i32
    %c0_i32_1 = arith.constant 0 : i32
    return %c0_i32, %c0_i32_0 : i32, i32
  }
  func.func @transform_3(%arg0: i32) -> (i32, i32, i32) {
    %c0_i32 = arith.constant 0 : i32
    %c0_i32_0 = arith.constant 0 : i32
    %c0_i32_1 = arith.constant 0 : i32
    return %arg0, %c0_i32, %c0_i32_0 : i32, i32, i32
  }
}

</mosaic_0001>

<bundles_post_ra>
// kernel: tpu_custom_call.1
= control target key start
LH: loop header
LB: loop body
LE: loop exit
PB: predicated region body
PF: predicated region fallthrough
CT: control target
= control target key end

     0   :  { %8 = vsyncpa [#allocation3], 0  ;;  %s5048_s0 = inlined_call_operand.hbm [shape: bf16[2,16,216], index: 0, kind: input, shape index: {}]   ;;  %s5049_s1 = inlined_call_operand.hbm [shape: bf16[216,1024], index: 1, kind: input, shape index: {}]   ;;  %s5050_s2 = inlined_call_operand.hbm [shape: f32[1,1024], index: 2, kind: input, shape index: {}]   ;;  %s5051_s3 = inlined_call_operand.hbm [shape: f32[2,8,512], index: 3, kind: output, shape index: {}]  }
   0x1   :  { %9 = vsyncpa [#allocation6], 0 }
   0x2   :  { %10 = vsyncpa [#allocation4], 0  ;;  %s3732_s12 = smov [#allocation5]  }
   0x3   :  { %s28_s13 = sshll.u32 %s3732_s12, 4  ;;  %s29_s13 = int_to_ptr.vmem [resolvable:$true] %s28_s13 }
   0x4   :  { %s3654_s14 = scalar_lea.vmem %s29_s13, 13824  ;;  %p3659_p1 = scmp.lt.s32.totalorder %s29_s13, %s29_s13 }
   0x5   :  { %p3655_p0 = scmp.ne.s32.totalorder %s29_s13, %s3654_s14  ;;  %p3660_p2 = scmp.lt.s32.totalorder %s3654_s14, %s3654_s14 }
   0x7   :  { %p3661_p3 = por %p3660_p2, %p3659_p1 }
   0x9   :  { %p3662_p4 = pnand %p3661_p3, %p3655_p0 }
   0xb   :  { %3665 = shalt.err (!%p3662_p4)
}
   0xc   :  { %s3733_s15 = smov 512   ;;  %s3734_s16 = smov 32  }
   0xd   :  { %34 = dma.hbm_to_vmem [thread:$0]  %s5049_s1, 13824, %s29_s13, [#allocation6], %s3733_s15, %s3733_s15, %s3734_s16  }
   0xe   :  { %s3735_s19 = smov [#allocation2]  }
   0xf   :  { %s16_s20 = sshll.u32 %s3735_s19, 4  ;;  %s17_s20 = int_to_ptr.vmem [resolvable:$true] %s16_s20 }
  0x10   :  { %s3674_s21 = scalar_lea.vmem %s17_s20, 512  ;;  %p3679_p6 = scmp.lt.s32.totalorder %s17_s20, %s17_s20 }
  0x11   :  { %p3675_p5 = scmp.ne.s32.totalorder %s17_s20, %s3674_s21  ;;  %p3680_p7 = scmp.lt.s32.totalorder %s3674_s21, %s3674_s21 }
  0x13   :  { %p3681_p8 = por %p3680_p7, %p3679_p6 }
  0x15   :  { %p3682_p9 = pnand %p3681_p8, %p3675_p5 }
  0x17   :  { %3685 = shalt.err (!%p3682_p9)
}
  0x18   :  { %s3736_s22 = smov 128   ;;  %s3737_s23 = smov 8  }
  0x19   :  { %22 = dma.hbm_to_vmem [thread:$0]  %s5048_s0, 512, %s17_s20, [#allocation3], %s3736_s22, %s3736_s22, %s3737_s23  }
  0x1a   :  { %s3738_s26 = smov [#allocation7]  }
  0x1b   :  { %s41_s27 = sshll.u32 %s3738_s26, 4  ;;  %s42_s27 = int_to_ptr.vmem [resolvable:$true] %s41_s27 }
  0x1c   :  { %s3694_s1 = scalar_lea.vmem %s42_s27, 128  ;;  %p3699_p11 = scmp.lt.s32.totalorder %s42_s27, %s42_s27 }
  0x1d   :  { %p3695_p10 = scmp.ne.s32.totalorder %s42_s27, %s3694_s1  ;;  %p3700_p12 = scmp.lt.s32.totalorder %s3694_s1, %s3694_s1 }
  0x1f   :  { %p3701_p13 = por %p3700_p12, %p3699_p11 }
  0x21   :  { %p3702_p0 = pnand %p3701_p13, %p3695_p10 }
  0x23   :  { %3705 = shalt.err (!%p3702_p0)
}
  0x24   :  { %44 = dma.hbm_to_vmem [thread:$0]  %s5050_s2, 128, %s42_s27, [#allocation6]  }
  0x25   :  { %3726 = dma.done.wait [#allocation3], 512  }
  0x26   :  { %3727 = vsyncadd [#allocation3], 4294966784 }
  0x27   :  { %3728 = dma.done.wait [#allocation6], 13952  }
  0x28   :  { %3729 = vsyncadd [#allocation6], 4294953344  ;;  %v115_v0 = vld [vmem:[#allocation5 + $0x1c0] sm:$0xff]  ;;  %v116_v2 = vld [vmem:[#allocation5 + $0x1c8] sm:$0xff]  ;;  %vm767_vm0 = vcmask 719872   ;;  %vm774_vm1 = vcmask 1043456  }
  0x29   :  { %v119_v1 = vld [vmem:[#allocation5 + $0x1e0] sm:$0xff]  ;;  %v120_v4 = vld [vmem:[#allocation5 + $0x1e8] sm:$0xff]  ;;  %vm1624_vm2 = vcmask 1041409   ;;  %vm1626_vm3 = vcmask 1043459   ;;  %vm1628_vm4 = vcmask 1045509   ;;  %vm1630_vm5 = vcmask 1047559  }
  0x2a   :  { %v3505_v3 = vcombine.high %v115_v0, %v119_v1  ;;  %v3504_v5 = vcombine.low %v115_v0, %v119_v1  ;;  %v107_v6 = vld [vmem:[#allocation5 + $0x180] sm:$0xff]  ;;  %v3507_v8 = vcombine.high %v116_v2, %v120_v4  ;;  %v3506_v9 = vcombine.low %v116_v2, %v120_v4  ;;  %v108_v11 = vld [vmem:[#allocation5 + $0x188] sm:$0xff]  ;;  %s3741_s0 = smov 64   ;;  %s3743_s2 = smov [#allocation8]  }
  0x2b   :  { %v111_v7 = vld [vmem:[#allocation5 + $0x1a0] sm:$0xff]  ;;  %v112_v12 = vld [vmem:[#allocation5 + $0x1a8] sm:$0xff]  ;;  %vm3401_vm6 = vcmask 523264   ;;  %s3431_s30 = sshll.u32 %s3743_s2, 4  ;;  %s3432_s30 = int_to_ptr.vmem [resolvable:$true] %s3431_s30 }
  0x2c   :  { %v3497_v10 = vcombine.high %v107_v6, %v111_v7  ;;  %v99_v13 = vld [vmem:[#allocation5 + $0x140] sm:$0xff]  ;;  %799 = vmatprep.subr.bf16.mxu0 %v3505_v3  ;;  %v3499_v14 = vcombine.high %v108_v11, %v112_v12  ;;  %v100_v16 = vld [vmem:[#allocation5 + $0x148] sm:$0xff]  ;;  %852 = vmatprep.subr.bf16.mxu1 %v3507_v8  ;;  %v3496_v18 = vcombine.low %v107_v6, %v111_v7  ;;  %s3706_s4 = scalar_lea.vmem %s3432_s30, 1024  ;;  %p3711_p2 = scmp.lt.s32.totalorder %s3432_s30, %s3432_s30 }
  0x2d   :  { %v103_v15 = vld [vmem:[#allocation5 + $0x160] sm:$0xff]  ;;  %v104_v17 = vld [vmem:[#allocation5 + $0x168] sm:$0xff]  ;;  %800 = vmatpush1.bf16.msra.mxu0 %v3504_v5  ;;  %853 = vmatpush1.bf16.msra.mxu1 %v3506_v9  ;;  %v3498_v19 = vcombine.low %v108_v11, %v112_v12  ;;  %p3707_p1 = scmp.ne.s32.totalorder %s3432_s30, %s3706_s4  ;;  %p3712_p3 = scmp.lt.s32.totalorder %s3706_s4, %s3706_s4 }
  0x2e   :  { %801 = vmatprep.subr.bf16.mxu0 %v3497_v10  ;;  %v3489_v20 = vcombine.high %v99_v13, %v103_v15  ;;  %854 = vmatprep.subr.bf16.mxu1 %v3499_v14  ;;  %v3491_v21 = vcombine.high %v100_v16, %v104_v17  ;;  %v91_v22 = vld [vmem:[#allocation5 + $0x100] sm:$0xff]  ;;  %v92_v24 = vld [vmem:[#allocation5 + $0x108] sm:$0xff]  ;;  %v3488_v26 = vcombine.low %v99_v13, %v103_v15 }
  0x2f   :  { %v95_v23 = vld [vmem:[#allocation5 + $0x120] sm:$0xff]  ;;  %v96_v25 = vld [vmem:[#allocation5 + $0x128] sm:$0xff]  ;;  %v3490_v27 = vcombine.low %v100_v16, %v104_v17  ;;  %p3713_p4 = por %p3712_p3, %p3711_p2 }
  0x30   :  { %v3481_v28 = vcombine.high %v91_v22, %v95_v23  ;;  %v3483_v29 = vcombine.high %v92_v24, %v96_v25  ;;  %v83_v30 = vld [vmem:[#allocation5 + $0xc0] sm:$0xff]  ;;  %v84_v32 = vld [vmem:[#allocation5 + $0xc8] sm:$0xff]  ;;  %v3480_v34 = vcombine.low %v91_v22, %v95_v23  ;;  %v3482_v35 = vcombine.low %v92_v24, %v96_v25 }
  0x31   :  { %802 = vmatpush1.bf16.msra.mxu0 %v3496_v18  ;;  %855 = vmatpush1.bf16.msra.mxu1 %v3498_v19  ;;  %v87_v31 = vld [vmem:[#allocation5 + $0xe0] sm:$0xff]  ;;  %v88_v33 = vld [vmem:[#allocation5 + $0xe8] sm:$0xff]  ;;  %p3714_p5 = pnand %p3713_p4, %p3707_p1 }
  0x32   :  { %803 = vmatprep.subr.bf16.mxu0 %v3489_v20  ;;  %856 = vmatprep.subr.bf16.mxu1 %v3491_v21  ;;  %v3473_v36 = vcombine.high %v83_v30, %v87_v31  ;;  %v3475_v37 = vcombine.high %v84_v32, %v88_v33  ;;  %v75_v38 = vld [vmem:[#allocation5 + $0x80] sm:$0xff]  ;;  %v76_v40 = vld [vmem:[#allocation5 + $0x88] sm:$0xff]  ;;  %v3472_v42 = vcombine.low %v83_v30, %v87_v31 }
  0x33   :  { %v79_v39 = vld [vmem:[#allocation5 + $0xa0] sm:$0xff]  ;;  %v80_v41 = vld [vmem:[#allocation5 + $0xa8] sm:$0xff]  ;;  %v3474_v43 = vcombine.low %v84_v32, %v88_v33 }
  0x34   :  { %v3465_v44 = vcombine.high %v75_v38, %v79_v39  ;;  %v67_v45 = vld [vmem:[#allocation5 + $0x40] sm:$0xff]  ;;  %v3467_v47 = vcombine.high %v76_v40, %v80_v41  ;;  %v68_v49 = vld [vmem:[#allocation5 + $0x48] sm:$0xff]  ;;  %v3464_v51 = vcombine.low %v75_v38, %v79_v39  ;;  %v3466_v52 = vcombine.low %v76_v40, %v80_v41 }
  0x35   :  { %804 = vmatpush1.bf16.msra.mxu0 %v3488_v26  ;;  %857 = vmatpush1.bf16.msra.mxu1 %v3490_v27  ;;  %v71_v46 = vld [vmem:[#allocation5 + $0x60] sm:$0xff]  ;;  %v72_v50 = vld [vmem:[#allocation5 + $0x68] sm:$0xff] }
  0x36   :  { %805 = vmatprep.subr.bf16.mxu0 %v3481_v28  ;;  %858 = vmatprep.subr.bf16.mxu1 %v3483_v29  ;;  %v3776_v48 = vld [vmem:[#allocation2 + $0x4] ss:$8 sps:$4 sm:$0xff]   ;;  %v3457_v53 = vcombine.high %v67_v45, %v71_v46  ;;  %v3459_v54 = vcombine.high %v68_v49, %v72_v50  ;;  %v3456_v59 = vcombine.low %v67_v45, %v71_v46 }
  0x37   :  { %3561 = vmatprep.mubr.msk.bf16.mxu0 %vm767_vm0, %v3776_v48  ;;  %v59_v55 = vld [vmem:[#allocation5] sm:$0xff]  ;;  %3564 = vmatprep.mubr.msk.bf16.mxu1 %vm767_vm0, %v3776_v48  ;;  %v60_v57 = vld [vmem:[#allocation5 + $0x8] sm:$0xff]  ;;  %v3458_v60 = vcombine.low %v68_v49, %v72_v50  ;;  %v121_v49 = vld [vmem:[#allocation5 + $0x1f0] sm:$0xff] }
  0x38   :  { %v63_v56 = vld [vmem:[#allocation5 + $0x20] sm:$0xff]  ;;  %v64_v58 = vld [vmem:[#allocation5 + $0x28] sm:$0xff]  ;;  %v118_v50 = vld [vmem:[#allocation5 + $0x1d8] sm:$0xff] }
  0x39   :  { %806 = vmatpush1.bf16.msra.mxu0 %v3480_v34  ;;  %859 = vmatpush1.bf16.msra.mxu1 %v3482_v35  ;;  %v3449_v61 = vcombine.high %v59_v55, %v63_v56  ;;  %v3451_v62 = vcombine.high %v60_v57, %v64_v58  ;;  %v163_v63 = vld [vmem:[#allocation5 + $0x340] sm:$0xff]  ;;  %v164_v0 = vld [vmem:[#allocation5 + $0x348] sm:$0xff]  ;;  %v3448_v1 = vcombine.low %v59_v55, %v63_v56  ;;  %v109_v56 = vld [vmem:[#allocation5 + $0x190] sm:$0xff] }
  0x3a   :  { %807 = vmatprep.subr.bf16.mxu0 %v3473_v36  ;;  %860 = vmatprep.subr.bf16.mxu1 %v3475_v37  ;;  %v3450_v2 = vcombine.low %v60_v57, %v64_v58  ;;  %v3553_v3 = vcombine.high %v163_v63, %v163_v63  ;;  %v3552_v4 = vcombine.low %v163_v63, %v163_v63  ;;  %v155_v7 = vld [vmem:[#allocation5 + $0x300] sm:$0xff]  ;;  %v156_v9 = vld [vmem:[#allocation5 + $0x308] sm:$0xff]  ;;  %v113_v57 = vld [vmem:[#allocation5 + $0x1b0] sm:$0xff] }
  0x3b   :  { %v3555_v5 = vcombine.high %v164_v0, %v164_v0  ;;  %v3554_v6 = vcombine.low %v164_v0, %v164_v0  ;;  %v159_v8 = vld [vmem:[#allocation5 + $0x320] sm:$0xff]  ;;  %v160_v10 = vld [vmem:[#allocation5 + $0x328] sm:$0xff]  ;;  %v3501_v63 = vcombine.high %v109_v56, %v113_v57 }
  0x3c   :  { %v776_v11 = vsel %vm774_vm1, %v3552_v4, 0  ;;  %v3545_v12 = vcombine.high %v155_v7, %v159_v8  ;;  %v3547_v14 = vcombine.high %v156_v9, %v160_v10  ;;  %v147_v15 = vld [vmem:[#allocation5 + $0x2c0] sm:$0xff]  ;;  %v148_v17 = vld [vmem:[#allocation5 + $0x2c8] sm:$0xff]  ;;  %v3544_v19 = vcombine.low %v155_v7, %v159_v8  ;;  %v102_v4 = vld [vmem:[#allocation5 + $0x158] sm:$0xff] }
  0x3d   :  { %808 = vmatpush1.bf16.msra.mxu0 %v3472_v42  ;;  %861 = vmatpush1.bf16.msra.mxu1 %v3474_v43  ;;  %v782_v13 = vsel %vm774_vm1, %v3554_v6, 0  ;;  %v151_v16 = vld [vmem:[#allocation5 + $0x2e0] sm:$0xff]  ;;  %v152_v18 = vld [vmem:[#allocation5 + $0x2e8] sm:$0xff]  ;;  %v3546_v20 = vcombine.low %v156_v9, %v160_v10  ;;  %v3500_v6 = vcombine.low %v109_v56, %v113_v57  ;;  %v93_v10 = vld [vmem:[#allocation5 + $0x110] sm:$0xff] }
  0x3e   :  { %809 = vmatprep.subr.bf16.mxu0 %v3465_v44  ;;  %862 = vmatprep.subr.bf16.mxu1 %v3467_v47  ;;  %v3537_v21 = vcombine.high %v147_v15, %v151_v16  ;;  %v3539_v22 = vcombine.high %v148_v17, %v152_v18  ;;  %v139_v23 = vld [vmem:[#allocation5 + $0x280] sm:$0xff]  ;;  %v140_v25 = vld [vmem:[#allocation5 + $0x288] sm:$0xff]  ;;  %v3536_v27 = vcombine.low %v147_v15, %v151_v16  ;;  %v117_v47 = vld [vmem:[#allocation5 + $0x1d0] sm:$0xff] }
  0x3f   :  { %v143_v24 = vld [vmem:[#allocation5 + $0x2a0] sm:$0xff]  ;;  %v144_v26 = vld [vmem:[#allocation5 + $0x2a8] sm:$0xff]  ;;  %v3538_v28 = vcombine.low %v148_v17, %v152_v18 }
  0x40   :  { %v3529_v29 = vcombine.high %v139_v23, %v143_v24  ;;  %v3531_v30 = vcombine.high %v140_v25, %v144_v26  ;;  %v131_v31 = vld [vmem:[#allocation5 + $0x240] sm:$0xff]  ;;  %v132_v33 = vld [vmem:[#allocation5 + $0x248] sm:$0xff]  ;;  %v3528_v35 = vcombine.low %v139_v23, %v143_v24  ;;  %v3530_v36 = vcombine.low %v140_v25, %v144_v26 }
  0x41   :  { %810 = vmatpush1.bf16.msra.mxu0 %v3464_v51  ;;  %863 = vmatpush1.bf16.msra.mxu1 %v3466_v52  ;;  %v135_v32 = vld [vmem:[#allocation5 + $0x260] sm:$0xff]  ;;  %v136_v34 = vld [vmem:[#allocation5 + $0x268] sm:$0xff]  ;;  %v122_v51 = vld [vmem:[#allocation5 + $0x1f8] sm:$0xff] }
  0x42   :  { %811 = vmatprep.subr.bf16.mxu0 %v3457_v53  ;;  %864 = vmatprep.subr.bf16.mxu1 %v3459_v54  ;;  %v3521_v37 = vcombine.high %v131_v31, %v135_v32  ;;  %v3523_v38 = vcombine.high %v132_v33, %v136_v34  ;;  %v123_v39 = vld [vmem:[#allocation5 + $0x200] sm:$0xff]  ;;  %v124_v41 = vld [vmem:[#allocation5 + $0x208] sm:$0xff]  ;;  %v3520_v43 = vcombine.low %v131_v31, %v135_v32 }
  0x43   :  { %v127_v40 = vld [vmem:[#allocation5 + $0x220] sm:$0xff]  ;;  %v128_v42 = vld [vmem:[#allocation5 + $0x228] sm:$0xff]  ;;  %v3522_v44 = vcombine.low %v132_v33, %v136_v34  ;;  %v3509_v54 = vcombine.high %v117_v47, %v121_v49  ;;  %v3511_v55 = vcombine.high %v118_v50, %v122_v51 }
  0x44   :  { %v3513_v45 = vcombine.high %v123_v39, %v127_v40  ;;  %v3515_v46 = vcombine.high %v124_v41, %v128_v42  ;;  %v3512_v52 = vcombine.low %v123_v39, %v127_v40  ;;  %v3514_v53 = vcombine.low %v124_v41, %v128_v42  ;;  %v3786_v58 = vld [vmem:[#allocation2] ss:$8 sps:$4 sm:$0xff]   ;;  %v61_v42 = vld [vmem:[#allocation5 + $0x10] sm:$0xff] }
  0x45   :  { %812 = vmatpush1.bf16.msra.mxu0 %v3456_v59  ;;  %865 = vmatpush1.bf16.msra.mxu1 %v3458_v60  ;;  %v110_v59 = vld [vmem:[#allocation5 + $0x198] sm:$0xff] }
  0x46   :  { %813 = vmatprep.subr.bf16.mxu0 %v3449_v61  ;;  %866 = vmatprep.subr.bf16.mxu1 %v3451_v62  ;;  %v114_v60 = vld [vmem:[#allocation5 + $0x1b8] sm:$0xff]  ;;  %v3508_v61 = vcombine.low %v117_v47, %v121_v49  ;;  %v3510_v62 = vcombine.low %v118_v50, %v122_v51  ;;  %v165_v51 = vld [vmem:[#allocation5 + $0x350] sm:$0xff] }
  0x47   :  { %v3503_v0 = vcombine.high %v110_v59, %v114_v60  ;;  %v3502_v7 = vcombine.low %v110_v59, %v114_v60  ;;  %v3556_v56 = vcombine.low %v165_v51, %v165_v51  ;;  %v157_v60 = vld [vmem:[#allocation5 + $0x310] sm:$0xff] }
  0x49   :  { %814 = vmatpush1.bf16.msra.mxu0 %v3448_v1  ;;  %867 = vmatpush1.bf16.msra.mxu1 %v3450_v2  ;;  %v101_v1 = vld [vmem:[#allocation5 + $0x150] sm:$0xff] }
  0x4a   :  { %3560 = vmatprep.subr.msk.bf16.mxu0 %vm774_vm1, %v3553_v3  ;;  %3563 = vmatprep.subr.msk.bf16.mxu1 %vm774_vm1, %v3555_v5  ;;  %v105_v2 = vld [vmem:[#allocation5 + $0x170] sm:$0xff]  ;;  %v106_v5 = vld [vmem:[#allocation5 + $0x178] sm:$0xff] }
  0x4b   :  { %v3788_v3 = vld [vmem:[#allocation2 + $0x14] ss:$8 sps:$4 sm:$0xff]   ;;  %v3493_v8 = vcombine.high %v101_v1, %v105_v2  ;;  %v3495_v9 = vcombine.high %v102_v4, %v106_v5  ;;  %v3492_v15 = vcombine.low %v101_v1, %v105_v2  ;;  %v3494_v16 = vcombine.low %v102_v4, %v106_v5 }
  0x4c   :  { %v149_v5 = vld [vmem:[#allocation5 + $0x2d0] sm:$0xff] }
  0x4d   :  { %820 = vmatpush2.bf16.msra.mxu0 %v776_v11  ;;  %873 = vmatpush2.bf16.msra.mxu1 %v782_v13  ;;  %v97_v11 = vld [vmem:[#allocation5 + $0x130] sm:$0xff]  ;;  %v98_v13 = vld [vmem:[#allocation5 + $0x138] sm:$0xff] }
  0x4e   :  { %821 = vmatprep.subr.bf16.mxu0 %v3545_v12  ;;  %874 = vmatprep.subr.bf16.mxu1 %v3547_v14  ;;  %v94_v12 = vld [vmem:[#allocation5 + $0x118] sm:$0xff]  ;;  %v3485_v17 = vcombine.high %v93_v10, %v97_v11  ;;  %v3484_v23 = vcombine.low %v93_v10, %v97_v11 }
  0x4f   :  { %v3796_v14 = vld [vmem:[#allocation2 + $0x10] ss:$8 sps:$4 sm:$0xff]   ;;  %v3487_v18 = vcombine.high %v94_v12, %v98_v13  ;;  %v3486_v24 = vcombine.low %v94_v12, %v98_v13 }
  0x50   :  { %v141_v13 = vld [vmem:[#allocation5 + $0x290] sm:$0xff] }
  0x51   :  { %822 = vmatpush2.bf16.msra.mxu0 %v3544_v19  ;;  %875 = vmatpush2.bf16.msra.mxu1 %v3546_v20  ;;  %v85_v19 = vld [vmem:[#allocation5 + $0xd0] sm:$0xff] }
  0x52   :  { %823 = vmatprep.subr.bf16.mxu0 %v3537_v21  ;;  %876 = vmatprep.subr.bf16.mxu1 %v3539_v22  ;;  %v89_v20 = vld [vmem:[#allocation5 + $0xf0] sm:$0xff]  ;;  %v86_v21 = vld [vmem:[#allocation5 + $0xd8] sm:$0xff] }
  0x53   :  { %v90_v22 = vld [vmem:[#allocation5 + $0xf8] sm:$0xff]  ;;  %v3477_v25 = vcombine.high %v85_v19, %v89_v20  ;;  %v3476_v31 = vcombine.low %v85_v19, %v89_v20 }
  0x54   :  { %v3479_v26 = vcombine.high %v86_v21, %v90_v22  ;;  %v3478_v32 = vcombine.low %v86_v21, %v90_v22  ;;  %v133_v22 = vld [vmem:[#allocation5 + $0x250] sm:$0xff] }
  0x55   :  { %824 = vmatpush2.bf16.msra.mxu0 %v3536_v27  ;;  %877 = vmatpush2.bf16.msra.mxu1 %v3538_v28  ;;  %v77_v27 = vld [vmem:[#allocation5 + $0x90] sm:$0xff] }
  0x56   :  { %825 = vmatprep.subr.bf16.mxu0 %v3529_v29  ;;  %878 = vmatprep.subr.bf16.mxu1 %v3531_v30  ;;  %v81_v28 = vld [vmem:[#allocation5 + $0xb0] sm:$0xff]  ;;  %v78_v29 = vld [vmem:[#allocation5 + $0x98] sm:$0xff] }
  0x57   :  { %v82_v30 = vld [vmem:[#allocation5 + $0xb8] sm:$0xff]  ;;  %v3469_v33 = vcombine.high %v77_v27, %v81_v28  ;;  %v3468_v39 = vcombine.low %v77_v27, %v81_v28 }
  0x58   :  { %v3471_v34 = vcombine.high %v78_v29, %v82_v30  ;;  %v3470_v40 = vcombine.low %v78_v29, %v82_v30  ;;  %v125_v30 = vld [vmem:[#allocation5 + $0x210] sm:$0xff] }
  0x59   :  { %826 = vmatpush2.bf16.msra.mxu0 %v3528_v35  ;;  %879 = vmatpush2.bf16.msra.mxu1 %v3530_v36  ;;  %v69_v35 = vld [vmem:[#allocation5 + $0x50] sm:$0xff] }
  0x5a   :  { %827 = vmatprep.subr.bf16.mxu0 %v3521_v37  ;;  %880 = vmatprep.subr.bf16.mxu1 %v3523_v38  ;;  %v73_v36 = vld [vmem:[#allocation5 + $0x70] sm:$0xff]  ;;  %v70_v37 = vld [vmem:[#allocation5 + $0x58] sm:$0xff] }
  0x5b   :  { %v74_v38 = vld [vmem:[#allocation5 + $0x78] sm:$0xff]  ;;  %v3461_v41 = vcombine.high %v69_v35, %v73_v36 }
  0x5c   :  { %v3462_v47 = vcombine.low %v70_v37, %v74_v38 }
  0x5d   :  { %828 = vmatpush2.bf16.msra.mxu0 %v3520_v43  ;;  %881 = vmatpush2.bf16.msra.mxu1 %v3522_v44  ;;  %v65_v43 = vld [vmem:[#allocation5 + $0x30] sm:$0xff]  ;;  %v62_v44 = vld [vmem:[#allocation5 + $0x18] sm:$0xff] }
  0x5e   :  { %829 = vmatprep.subr.bf16.mxu0 %v3513_v45  ;;  %882 = vmatprep.subr.bf16.mxu1 %v3515_v46  ;;  %v66_v45 = vld [vmem:[#allocation5 + $0x38] sm:$0xff]  ;;  %v3460_v46 = vcombine.low %v69_v35, %v73_v36  ;;  %v3453_v49 = vcombine.high %v61_v42, %v65_v43 }
  0x5f   :  { %v3455_v50 = vcombine.high %v62_v44, %v66_v45 }
  0x61   :  { %830 = vmatpush2.bf16.msra.mxu0 %v3512_v52  ;;  %883 = vmatpush2.bf16.msra.mxu1 %v3514_v53  ;;  %v166_v52 = vld [vmem:[#allocation5 + $0x358] sm:$0xff]  ;;  %v3452_v53 = vcombine.low %v61_v42, %v65_v43  ;;  %v3739_v43 = vmov 1983009808  }
  0x62   :  { %905 = vmatprep.subr.bf16.mxu0 %v3509_v54  ;;  %958 = vmatprep.subr.bf16.mxu1 %v3511_v55  ;;  %v3454_v54 = vcombine.low %v62_v44, %v66_v45  ;;  %v3557_v55 = vcombine.high %v165_v51, %v165_v51  ;;  %v3559_v57 = vcombine.high %v166_v52, %v166_v52  ;;  %v1048_v44 = vunpack.c.l.s4 %v3739_v43 }
  0x63   :  { %v3558_v59 = vcombine.low %v166_v52, %v166_v52 }
  0x64   :  { %832 = vmatmul.mubr.bf16.vlgmr.msra.gmra.mxu0 %v3786_v58  ;;  %885 = vmatmul.mubr.bf16.vlgmr.msra.gmra.mxu1 %v3786_v58 }
  0x65   :  { %906 = vmatpush1.bf16.msra.mxu0 %v3508_v61  ;;  %959 = vmatpush1.bf16.msra.mxu1 %v3510_v62  ;;  %v161_v61 = vld [vmem:[#allocation5 + $0x330] sm:$0xff]  ;;  %v158_v62 = vld [vmem:[#allocation5 + $0x318] sm:$0xff]  ;;  %v794_v2 = vsel %vm774_vm1, %v3558_v59, 0 }
  0x66   :  { %907 = vmatprep.subr.bf16.mxu0 %v3501_v63  ;;  %960 = vmatprep.subr.bf16.mxu1 %v3503_v0  ;;  %v162_v63 = vld [vmem:[#allocation5 + $0x338] sm:$0xff]  ;;  %v788_v0 = vsel %vm774_vm1, %v3556_v56, 0  ;;  %v3549_v1 = vcombine.high %v157_v60, %v161_v61 }
  0x67   :  { %3562 = vmatprep.mubr.msk.bf16.mxu0 %vm767_vm0, %v3788_v3  ;;  %3565 = vmatprep.mubr.msk.bf16.mxu1 %vm767_vm0, %v3788_v3  ;;  %v3551_v4 = vcombine.high %v158_v62, %v162_v63  ;;  %v3550_v10 = vcombine.low %v158_v62, %v162_v63 }
  0x69   :  { %908 = vmatpush1.bf16.msra.mxu0 %v3500_v6  ;;  %961 = vmatpush1.bf16.msra.mxu1 %v3502_v7  ;;  %v153_v6 = vld [vmem:[#allocation5 + $0x2f0] sm:$0xff]  ;;  %v150_v7 = vld [vmem:[#allocation5 + $0x2d8] sm:$0xff] }
  0x6a   :  { %909 = vmatprep.subr.bf16.mxu0 %v3493_v8  ;;  %962 = vmatprep.subr.bf16.mxu1 %v3495_v9  ;;  %v154_v8 = vld [vmem:[#allocation5 + $0x2f8] sm:$0xff]  ;;  %v3548_v9 = vcombine.low %v157_v60, %v161_v61  ;;  %v3541_v11 = vcombine.high %v149_v5, %v153_v6 }
  0x6b   :  { %v3543_v12 = vcombine.high %v150_v7, %v154_v8  ;;  %v3542_v19 = vcombine.low %v150_v7, %v154_v8 }
  0x6c   :  { %842 = vmatmul.mubr.bf16.gmra.mxu0 %v3796_v14  ;;  %895 = vmatmul.mubr.bf16.gmra.mxu1 %v3796_v14 }
  0x6d   :  { %910 = vmatpush1.bf16.msra.mxu0 %v3492_v15  ;;  %963 = vmatpush1.bf16.msra.mxu1 %v3494_v16  ;;  %v145_v15 = vld [vmem:[#allocation5 + $0x2b0] sm:$0xff]  ;;  %v142_v16 = vld [vmem:[#allocation5 + $0x298] sm:$0xff] }
  0x6e   :  { %911 = vmatprep.subr.bf16.mxu0 %v3485_v17  ;;  %964 = vmatprep.subr.bf16.mxu1 %v3487_v18  ;;  %v146_v17 = vld [vmem:[#allocation5 + $0x2b8] sm:$0xff]  ;;  %v3540_v18 = vcombine.low %v149_v5, %v153_v6  ;;  %v3533_v20 = vcombine.high %v141_v13, %v145_v15 }
  0x6f   :  { %3567 = vmatprep.mubr.msk.bf16.mxu0 %vm767_vm0, %v3776_v48  ;;  %3570 = vmatprep.mubr.msk.bf16.mxu1 %vm767_vm0, %v3776_v48  ;;  %v3463_v48 = vcombine.high %v70_v37, %v74_v38  ;;  %v3535_v21 = vcombine.high %v142_v16, %v146_v17  ;;  %v3534_v27 = vcombine.low %v142_v16, %v146_v17 }
  0x71   :  { %912 = vmatpush1.bf16.msra.mxu0 %v3484_v23  ;;  %965 = vmatpush1.bf16.msra.mxu1 %v3486_v24  ;;  %v137_v23 = vld [vmem:[#allocation5 + $0x270] sm:$0xff]  ;;  %v134_v24 = vld [vmem:[#allocation5 + $0x258] sm:$0xff] }
  0x72   :  { %913 = vmatprep.subr.bf16.mxu0 %v3477_v25  ;;  %966 = vmatprep.subr.bf16.mxu1 %v3479_v26  ;;  %v138_v25 = vld [vmem:[#allocation5 + $0x278] sm:$0xff]  ;;  %v3532_v26 = vcombine.low %v141_v13, %v145_v15  ;;  %v3525_v28 = vcombine.high %v133_v22, %v137_v23 }
  0x73   :  { %v3527_v29 = vcombine.high %v134_v24, %v138_v25  ;;  %v3526_v35 = vcombine.low %v134_v24, %v138_v25 }
  0x75   :  { %914 = vmatpush1.bf16.msra.mxu0 %v3476_v31  ;;  %967 = vmatpush1.bf16.msra.mxu1 %v3478_v32  ;;  %v129_v31 = vld [vmem:[#allocation5 + $0x230] sm:$0xff]  ;;  %v126_v32 = vld [vmem:[#allocation5 + $0x218] sm:$0xff] }
  0x76   :  { %915 = vmatprep.subr.bf16.mxu0 %v3469_v33  ;;  %968 = vmatprep.subr.bf16.mxu1 %v3471_v34  ;;  %v130_v33 = vld [vmem:[#allocation5 + $0x238] sm:$0xff]  ;;  %v3524_v34 = vcombine.low %v133_v22, %v137_v23  ;;  %v3517_v36 = vcombine.high %v125_v30, %v129_v31  ;;  %v3516_v38 = vcombine.low %v125_v30, %v129_v31 }
  0x77   :  { %v3519_v37 = vcombine.high %v126_v32, %v130_v33 }
  0x79   :  { %916 = vmatpush1.bf16.msra.mxu0 %v3468_v39  ;;  %969 = vmatpush1.bf16.msra.mxu1 %v3470_v40  ;;  %v3518_v39 = vcombine.low %v126_v32, %v130_v33  ;;  %v169_v40 = vlaneseq }
  0x7a   :  { %917 = vmatprep.subr.bf16.mxu0 %v3461_v41  ;;  %970 = vmatprep.subr.bf16.mxu1 %v3463_v48 }
  0x7b   :  { %v3816_v41 = vshrl.u32 %v169_v40, 7 }
  0x7d   :  { %918 = vmatpush1.bf16.msra.mxu0 %v3460_v46  ;;  %971 = vmatpush1.bf16.msra.mxu1 %v3462_v47  ;;  %v171_v48 = vsub.s32 0, %v3816_v41  ;;  %v175_v42 = vsub.s32 1, %v3816_v41  ;;  %v179_v45 = vsub.s32 2, %v3816_v41  ;;  %v183_v46 = vsub.s32 3, %v3816_v41 }
  0x7e   :  { %919 = vmatprep.subr.bf16.mxu0 %v3453_v49  ;;  %972 = vmatprep.subr.bf16.mxu1 %v3455_v50  ;;  %v1049_v50 = vunpack.c.0.s8 %v1048_v44  ;;  %v191_v25 = vsub.s32 5, %v3816_v41 }
  0x80   :  { %v3839_v60 = vsub.s32 %v1049_v50, %v3816_v41 }
  0x81   :  { %920 = vmatpush1.bf16.msra.mxu0 %v3452_v53  ;;  %973 = vmatpush1.bf16.msra.mxu1 %v3454_v54 }
  0x82   :  { %3566 = vmatprep.subr.msk.bf16.mxu0 %vm774_vm1, %v3557_v55  ;;  %3569 = vmatprep.subr.msk.bf16.mxu1 %vm774_vm1, %v3559_v57 }
  0x85   :  { %926 = vmatpush2.bf16.msra.mxu0 %v788_v0  ;;  %979 = vmatpush2.bf16.msra.mxu1 %v794_v2 }
  0x86   :  { %927 = vmatprep.subr.bf16.mxu0 %v3549_v1  ;;  %980 = vmatprep.subr.bf16.mxu1 %v3551_v4 }
  0x89   :  { %928 = vmatpush2.bf16.msra.mxu0 %v3548_v9  ;;  %981 = vmatpush2.bf16.msra.mxu1 %v3550_v10  ;;  %v187_v9 = vsub.s32 4, %v3816_v41 }
  0x8a   :  { %929 = vmatprep.subr.bf16.mxu0 %v3541_v11  ;;  %982 = vmatprep.subr.bf16.mxu1 %v3543_v12 }
  0x8d   :  { %930 = vmatpush2.bf16.msra.mxu0 %v3540_v18  ;;  %983 = vmatpush2.bf16.msra.mxu1 %v3542_v19  ;;  %v195_v19 = vsub.s32 6, %v3816_v41 }
  0x8e   :  { %931 = vmatprep.subr.bf16.mxu0 %v3533_v20  ;;  %984 = vmatprep.subr.bf16.mxu1 %v3535_v21 }
  0x91   :  { %932 = vmatpush2.bf16.msra.mxu0 %v3532_v26  ;;  %985 = vmatpush2.bf16.msra.mxu1 %v3534_v27 }
  0x92   :  { %933 = vmatprep.subr.bf16.mxu0 %v3525_v28  ;;  %986 = vmatprep.subr.bf16.mxu1 %v3527_v29 }
  0x95   :  { %934 = vmatpush2.bf16.msra.mxu0 %v3524_v34  ;;  %987 = vmatpush2.bf16.msra.mxu1 %v3526_v35 }
  0x96   :  { %935 = vmatprep.subr.bf16.mxu0 %v3517_v36  ;;  %988 = vmatprep.subr.bf16.mxu1 %v3519_v37  ;;  %v199_v37 = vsub.s32 7, %v3816_v41 }
  0x99   :  { %936 = vmatpush2.bf16.msra.mxu0 %v3516_v38  ;;  %989 = vmatpush2.bf16.msra.mxu1 %v3518_v39 }
  0x9c   :  { %938 = vmatmul.mubr.bf16.vlgmr.msra.gmra.mxu0 %v3786_v58  ;;  %991 = vmatmul.mubr.bf16.vlgmr.msra.gmra.mxu1 %v3786_v58  ;;  %v3820_v58 = vld [vmem:[#allocation7] sm:$0xff] }
  0x9d   :  { %3568 = vmatprep.mubr.msk.bf16.mxu0 %vm767_vm0, %v3788_v3  ;;  %3571 = vmatprep.mubr.msk.bf16.mxu1 %vm767_vm0, %v3788_v3  ;;  %v3740_v3 = vmov 1934713408   ;;  %v3825_v49 = vrot.slane %v3820_v58, %v171_v48  ;;  %v3831_v52 = vrot.slane %v3820_v58, %v179_v45  ;;  %v3834_v53 = vrot.slane %v3820_v58, %v183_v46 }
  0x9e   :  { %v2139_v47 = vunpack.c.l.s4 %v3740_v3 }
  0xa0   :  { %v2140_v55 = vunpack.c.0.s8 %v2139_v47 }
  0xa2   :  { %v3844_v5 = vsub.s32 %v2140_v55, %v3816_v41  ;;  %v3874_v55 = vrot.slane %v3820_v58, %v195_v19 }
  0xa4   :  { %948 = vmatmul.mubr.bf16.gmra.mxu0 %v3796_v14  ;;  %1001 = vmatmul.mubr.bf16.gmra.mxu1 %v3796_v14  ;;  %v3828_v14 = vrot.slane %v3820_v58, %v175_v42 }
 0x124   :  { %v833_v51 = vpop.f32.mrf.mxu0  ;;  %v886_v54 = vpop.f32.mrf.mxu1 }
 0x125   :  { %v834_v57 = vadd.f32 %v833_v51, %v3825_v49  ;;  %v887_v62 = vadd.f32 %v886_v54, %v3831_v52  ;;  %v3871_v54 = vrot.slane %v3820_v58, %v187_v9 }
 0x126   :  { %v835_v56 = vpop.f32.mrf.mxu0  ;;  %v888_v61 = vpop.f32.mrf.mxu1 }
 0x127   :  { %v836_v59 = vadd.f32 %v835_v56, %v3828_v14  ;;  %v889_v63 = vadd.f32 %v888_v61, %v3834_v53  ;;  %v3877_v56 = vrot.slane %v3820_v58, %v191_v25 }
 0x128   :  { %v837_v0 = vpop.f32.mrf.mxu0  ;;  %v890_v4 = vpop.f32.mrf.mxu1 }
 0x129   :  { %v1043_v1 = vcombine.low %v834_v57, %v836_v59  ;;  %v1044_v2 = vcombine.high %v834_v57, %v836_v59  ;;  %v1045_v6 = vcombine.low %v887_v62, %v889_v63  ;;  %v1046_v7 = vcombine.high %v887_v62, %v889_v63 }
 0x12a   :  { %v839_v8 = vpop.f32.mrf.mxu0  ;;  %v838_v12 = vadd.f32 %v837_v0, %v3825_v49  ;;  %v892_v15 = vpop.f32.mrf.mxu1  ;;  %v891_v20 = vadd.f32 %v890_v4, %v3831_v52  ;;  %v3880_v57 = vrot.slane %v3820_v58, %v199_v37 }
 0x12b   :  { %v1053_v10 = vrot.slane %v1043_v1, %v3839_v60  ;;  %v1060_v11 = vrot.slane %v1044_v2, %v3839_v60  ;;  %v840_v13 = vadd.f32 %v839_v8, %v3828_v14  ;;  %v1067_v16 = vrot.slane %v1045_v6, %v3839_v60 }
 0x12c   :  { %v1074_v17 = vrot.slane %v1046_v7, %v3839_v60  ;;  %v893_v18 = vadd.f32 %v892_v15, %v3834_v53  ;;  %v843_v23 = vpop.f32.mrf.mxu0  ;;  %v896_v24 = vpop.f32.mrf.mxu1 }
 0x12d   :  { %v1115_v21 = vcombine.low %v838_v12, %v840_v13  ;;  %v1116_v22 = vcombine.high %v838_v12, %v840_v13  ;;  %v1075_v26 = vcombine.low %v1053_v10, %v1067_v16  ;;  %v1076_v27 = vcombine.high %v1053_v10, %v1067_v16 }
 0x12e   :  { %v1077_v28 = vcombine.low %v1060_v11, %v1074_v17  ;;  %v1078_v29 = vcombine.high %v1060_v11, %v1074_v17  ;;  %v1117_v32 = vcombine.low %v891_v20, %v893_v18  ;;  %v1118_v33 = vcombine.high %v891_v20, %v893_v18  ;;  %v845_v42 = vpop.f32.mrf.mxu0  ;;  %v898_v43 = vpop.f32.mrf.mxu1 }
 0x12f   :  { %v1125_v30 = vrot.slane %v1115_v21, %v3839_v60  ;;  %v1132_v31 = vrot.slane %v1116_v22, %v3839_v60  ;;  %v3572_v34 = vrot.slane %v1075_v26, 9  ;;  %v3574_v35 = vrot.slane %v1076_v27, 9 }
 0x130   :  { %v3576_v36 = vrot.slane %v1077_v28, 9  ;;  %v3578_v38 = vrot.slane %v1078_v29, 9  ;;  %v1139_v39 = vrot.slane %v1117_v32, %v3839_v60  ;;  %v1146_v40 = vrot.slane %v1118_v33, %v3839_v60  ;;  %v847_v0 = vpop.f32.mrf.mxu0  ;;  %v900_v1 = vpop.f32.mrf.mxu1 }
 0x131   :  { %v844_v48 = vadd.f32 %v843_v23, %v3825_v49  ;;  %v3863_v44 = vmax.f32 %v1075_v26, %v3572_v34  ;;  %v3865_v45 = vmax.f32 %v1076_v27, %v3574_v35  ;;  %v846_v3 = vadd.f32 %v845_v42, %v3828_v14 }
 0x132   :  { %v3867_v46 = vmax.f32 %v1077_v28, %v3576_v36  ;;  %v1147_v47 = vcombine.low %v1125_v30, %v1139_v39  ;;  %v1148_v50 = vcombine.high %v1125_v30, %v1139_v39  ;;  %v1149_v41 = vcombine.low %v1132_v31, %v1146_v40  ;;  %v849_v20 = vpop.f32.mrf.mxu0  ;;  %v902_v21 = vpop.f32.mrf.mxu1 }
 0x133   :  { %v1150_v51 = vcombine.high %v1132_v31, %v1146_v40  ;;  %v3882_v59 = vmax.f32 %v1078_v29, %v3578_v38  ;;  %v1507_v61 = vrot.slane %v3863_v44, 2  ;;  %v1524_v62 = vrot.slane %v3865_v45, 4 }
 0x134   :  { %v897_v63 = vadd.f32 %v896_v24, %v3831_v52  ;;  %v1540_v2 = vrot.slane %v3865_v45, 6  ;;  %v3580_v4 = vrot.slane %v1147_v47, 9  ;;  %v3582_v6 = vrot.slane %v1148_v50, 9 }
 0x135   :  { %v3584_v7 = vrot.slane %v1149_v41, 9  ;;  %v1509_v8 = vrot.slane %v3867_v46, 2  ;;  %v3586_v9 = vrot.slane %v1150_v51, 9  ;;  %v1187_v58 = vcombine.low %v844_v48, %v846_v3 }
 0x136   :  { %v1188_v10 = vcombine.high %v844_v48, %v846_v3  ;;  %v1523_v11 = vrot.slane %v3863_v44, 4  ;;  %v1525_v12 = vrot.slane %v3867_v46, 4  ;;  %v3891_v13 = vmax.f32 %v1147_v47, %v3580_v4 }
 0x137   :  { %v899_v15 = vadd.f32 %v898_v43, %v3834_v53  ;;  %v1539_v16 = vrot.slane %v3863_v44, 6  ;;  %v1541_v17 = vrot.slane %v3867_v46, 6  ;;  %v3896_v18 = vrot.slane %v1524_v62, 7 }
 0x138   :  { %v3898_v19 = vmax.f32 %v1149_v41, %v3584_v7  ;;  %v3900_v22 = vrot.slane %v1540_v2, 7  ;;  %v3902_v23 = vmax.f32 %v1148_v50, %v3582_v6  ;;  %v3904_v24 = vmax.f32 %v1150_v51, %v3586_v9 }
 0x139   :  { %v848_v25 = vadd.f32 %v847_v0, %v3825_v49  ;;  %v1197_v26 = vrot.slane %v1187_v58, %v3839_v60  ;;  %v1204_v27 = vrot.slane %v1188_v10, %v3839_v60  ;;  %v1189_v28 = vcombine.low %v897_v63, %v899_v15 }
 0x13a   :  { %v1190_v29 = vcombine.high %v897_v63, %v899_v15  ;;  %v1511_v30 = vrot.slane %v3891_v13, 2  ;;  %v901_v31 = vadd.f32 %v900_v1, %v3831_v52  ;;  %v850_v32 = vadd.f32 %v849_v20, %v3828_v14 }
 0x13b   :  { %v903_v33 = vadd.f32 %v902_v21, %v3834_v53  ;;  %v1513_v34 = vrot.slane %v3898_v19, 2  ;;  %v1527_v35 = vrot.slane %v3891_v13, 4  ;;  %v1211_v49 = vrot.slane %v1189_v28, %v3839_v60 }
 0x13c   :  { %v1218_v36 = vrot.slane %v1190_v29, %v3839_v60  ;;  %v1259_v37 = vcombine.low %v848_v25, %v850_v32  ;;  %v1260_v38 = vcombine.high %v848_v25, %v850_v32  ;;  %v1526_v7 = vrot.slane %v3882_v59, 4 }
 0x13d   :  { %v1261_v39 = vcombine.low %v901_v31, %v903_v33  ;;  %v1262_v40 = vcombine.high %v901_v31, %v903_v33  ;;  %v1219_v48 = vcombine.low %v1197_v26, %v1211_v49  ;;  %v1220_v42 = vcombine.high %v1197_v26, %v1211_v49 }
 0x13e   :  { %v1221_v43 = vcombine.low %v1204_v27, %v1218_v36  ;;  %v1222_v52 = vcombine.high %v1204_v27, %v1218_v36  ;;  %v1269_v14 = vrot.slane %v1259_v37, %v3839_v60  ;;  %v1276_v53 = vrot.slane %v1260_v38, %v3839_v60 }
 0x13f   :  { %v1283_v3 = vrot.slane %v1261_v39, %v3839_v60  ;;  %v1290_v47 = vrot.slane %v1262_v40, %v3839_v60  ;;  %v3588_v50 = vrot.slane %v1219_v48, 9  ;;  %v3590_v41 = vrot.slane %v1220_v42, 9 }
 0x140   :  { %v3592_v51 = vrot.slane %v1221_v43, 9  ;;  %v3594_v62 = vrot.slane %v1222_v52, 9  ;;  %v1542_v9 = vrot.slane %v3882_v59, 6  ;;  %v1529_v58 = vrot.slane %v3898_v19, 4 }
 0x141   :  { %v1291_v63 = vcombine.low %v1269_v14, %v1283_v3  ;;  %v1292_v0 = vcombine.high %v1269_v14, %v1283_v3  ;;  %v1293_v1 = vcombine.low %v1276_v53, %v1290_v47  ;;  %v1294_v2 = vcombine.high %v1276_v53, %v1290_v47 }
 0x142   :  { %v3921_v4 = vmax.f32 %v1219_v48, %v3588_v50  ;;  %v3923_v6 = vmax.f32 %v1221_v43, %v3592_v51  ;;  %v1543_v10 = vrot.slane %v3891_v13, 6  ;;  %v1545_v15 = vrot.slane %v3898_v19, 6 }
 0x143   :  { %v3596_v20 = vrot.slane %v1291_v63, 9  ;;  %v3598_v21 = vrot.slane %v1292_v0, 9  ;;  %v3600_v25 = vrot.slane %v1293_v1, 9  ;;  %v3602_v26 = vrot.slane %v1294_v2, 9 }
 0x144   :  { %v1508_v27 = vrot.slane %v3865_v45, 2  ;;  %v3931_v28 = vmax.f32 %v1220_v42, %v3590_v41  ;;  %v3933_v29 = vmax.f32 %v1222_v52, %v3594_v62  ;;  %v1515_v31 = vrot.slane %v3921_v4, 2 }
 0x145   :  { %v1517_v32 = vrot.slane %v3923_v6, 2  ;;  %v1531_v33 = vrot.slane %v3921_v4, 4  ;;  %v1533_v49 = vrot.slane %v3923_v6, 4  ;;  %v1690_v36 = vrot.slane %v1526_v7, 7 }
 0x146   :  { %v1718_v37 = vrot.slane %v1542_v9, 7  ;;  %v1547_v38 = vrot.slane %v3921_v4, 6  ;;  %v1549_v39 = vrot.slane %v3923_v6, 6  ;;  %v3941_v40 = vmax.f32 %v1291_v63, %v3596_v20 }
 0x147   :  { %v1623_v48 = vrot.slane %v3865_v45, 7  ;;  %v3944_v42 = vmax.f32 %v1292_v0, %v3598_v21  ;;  %v3946_v43 = vmax.f32 %v1293_v1, %v3600_v25  ;;  %v3948_v52 = vmax.f32 %v1294_v2, %v3602_v26 }
 0x148   :  { %v1691_v14 = vsel %vm1624_vm2, %v1690_v36, %v1525_v12  ;;  %v1719_v3 = vsel %vm1624_vm2, %v1718_v37, %v1541_v17  ;;  %v1655_v45 = vrot.slane %v1508_v27, 7  ;;  %v1684_v12 = vsel %vm1624_vm2, %v3896_v18, %v1523_v11 }
 0x149   :  { %v1692_v53 = vsel %vm1626_vm3, %v1690_v36, %v1691_v14  ;;  %v1625_v47 = vsel %vm1624_vm2, %v1623_v48, %v3863_v44  ;;  %v1720_v41 = vsel %vm1626_vm3, %v1718_v37, %v1719_v3  ;;  %v1685_v9 = vsel %vm1626_vm3, %v3896_v18, %v1684_v12 }
 0x14a   :  { %v1693_v50 = vsel %vm1628_vm4, %v1690_v36, %v1692_v53  ;;  %v1627_v51 = vsel %vm1626_vm3, %v1623_v48, %v1625_v47  ;;  %v1721_v63 = vsel %vm1628_vm4, %v1718_v37, %v1720_v41  ;;  %v1656_v0 = vsel %vm1624_vm2, %v1655_v45, %v1507_v61 }
 0x14b   :  { %v1694_v62 = vsel %vm1630_vm5, %v1690_v36, %v1693_v50  ;;  %v1629_v17 = vsel %vm1628_vm4, %v1623_v48, %v1627_v51  ;;  %v1722_v1 = vsel %vm1630_vm5, %v1718_v37, %v1721_v63  ;;  %v1657_v7 = vsel %vm1626_vm3, %v1655_v45, %v1656_v0 }
 0x14c   :  { %v1631_v2 = vsel %vm1630_vm5, %v1623_v48, %v1629_v17  ;;  %v2182_v11 = vcombine.low %v1694_v62, %v1722_v1  ;;  %v1658_v20 = vsel %vm1628_vm4, %v1655_v45, %v1657_v7  ;;  %v1686_v21 = vsel %vm1628_vm4, %v3896_v18, %v1685_v9 }
 0x14d   :  { %v1712_v61 = vsel %vm1624_vm2, %v3900_v22, %v1539_v16  ;;  %v1659_v25 = vsel %vm1630_vm5, %v1655_v45, %v1658_v20  ;;  %v1687_v26 = vsel %vm1630_vm5, %v3896_v18, %v1686_v21  ;;  %v1510_v36 = vrot.slane %v3882_v59, 2 }
 0x14e   :  { %v1713_v27 = vsel %vm1626_vm3, %v3900_v22, %v1712_v61  ;;  %v3991_v37 = vrot.slane %v2182_v11, %v3844_v5  ;;  %v2137_v48 = vcombine.low %v1631_v2, %v1659_v25  ;;  %v1634_v14 = vrot.slane %v3882_v59, 7 }
 0x14f   :  { %v1714_v44 = vsel %vm1628_vm4, %v3900_v22, %v1713_v27  ;;  %v1662_v53 = vrot.slane %v1510_v36, 7  ;;  %v1528_v18 = vrot.slane %v3902_v23, 4  ;;  %v1544_v3 = vrot.slane %v3902_v23, 6 }
 0x150   :  { %v1715_v16 = vsel %vm1630_vm5, %v3900_v22, %v1714_v44  ;;  %2507 = vrot.lane.b32.xlu1 %v3991_v37, %s3741_s0  ;;  %v4004_v45 = vrot.slane %v2137_v48, %v3844_v5  ;;  %v1635_v59 = vsel %vm1624_vm2, %v1634_v14, %v3867_v46  ;;  %v5052_v63 = vmov 0.0  }
 0x151   :  { %v2146_v50 = vcombine.low %v1687_v26, %v1715_v16  ;;  %v1636_v22 = vsel %vm1626_vm3, %v1634_v14, %v1635_v59  ;;  %v1663_v41 = vsel %vm1624_vm2, %v1662_v53, %v1509_v8  ;;  %v1697_v51 = vrot.slane %v1528_v18, 7 }
 0x152   :  { %v1725_v12 = vrot.slane %v1544_v3, 7  ;;  %2489 = vrot.lane.b32.xlu0 %v4004_v45, %s3741_s0  ;;  %v4019_v17 = vcombine.high %v3991_v37, %v5052_v63  ;;  %v1637_v0 = vsel %vm1628_vm4, %v1634_v14, %v1636_v22  ;;  %v1664_v1 = vsel %vm1626_vm3, %v1662_v53, %v1663_v41 }
 0x153   :  { %v4015_v62 = vrot.slane %v2146_v50, %v3844_v5  ;;  %v1638_v46 = vsel %vm1630_vm5, %v1634_v14, %v1637_v0  ;;  %v1665_v8 = vsel %vm1628_vm4, %v1662_v53, %v1664_v1  ;;  %v1698_v2 = vsel %vm1624_vm2, %v1697_v51, %v1527_v35 }
 0x154   :  { %v1726_v7 = vsel %vm1624_vm2, %v1725_v12, %v1543_v10  ;;  %v1666_v11 = vsel %vm1630_vm5, %v1662_v53, %v1665_v8  ;;  %v1699_v20 = vsel %vm1626_vm3, %v1697_v51, %v1698_v2  ;;  %v1530_v35 = vrot.slane %v3904_v24, 4 }
 0x155   :  { %v4033_v9 = vcombine.high %v4015_v62, %v5052_v63  ;;  %v1727_v21 = vsel %vm1626_vm3, %v1725_v12, %v1726_v7  ;;  %v2173_v61 = vcombine.low %v1638_v46, %v1666_v11  ;;  %v1700_v25 = vsel %vm1628_vm4, %v1697_v51, %v1699_v20 }
 0x156   :  { %v1728_v26 = vsel %vm1628_vm4, %v1725_v12, %v1727_v21  ;;  %2491 = vrot.lane.b32.xlu0 %v4015_v62, %s3741_s0  ;;  %v1701_v10 = vsel %vm1630_vm5, %v1697_v51, %v1700_v25  ;;  %v1546_v36 = vrot.slane %v3904_v24, 6  ;;  %v1512_v48 = vrot.slane %v3902_v23, 2 }
 0x157   :  { %2499 = vrot.lane.b32.xlu1 %v4033_v9, %s3741_s0  ;;  %v1729_v27 = vsel %vm1630_vm5, %v1725_v12, %v1728_v26  ;;  %v4050_v44 = vrot.slane %v2173_v61, %v3844_v5  ;;  %v1704_v16 = vrot.slane %v1530_v35, 7  ;;  %v1641_v53 = vrot.slane %v3902_v23, 7 }
 0x158   :  { %v2218_v14 = vcombine.low %v1701_v10, %v1729_v27  ;;  %v4055_v18 = vcombine.high %v4004_v45, %v5052_v63  ;;  %v1732_v3 = vrot.slane %v1546_v36, 7  ;;  %v1669_v50 = vrot.slane %v1512_v48, 7 }
 0x159   :  { %v1514_v59 = vrot.slane %v3904_v24, 2  ;;  %v1705_v41 = vsel %vm1624_vm2, %v1704_v16, %v1529_v58  ;;  %v1642_v51 = vsel %vm1624_vm2, %v1641_v53, %v3891_v13  ;;  %v1648_v23 = vrot.slane %v3904_v24, 7 }
 0x15a   :  { %v4059_v22 = vrot.slane %v2218_v14, %v3844_v5  ;;  %2505 = vrot.lane.b32.xlu0 %v4050_v44, %s3741_s0  ;;  %v1706_v12 = vsel %vm1626_vm3, %v1704_v16, %v1705_v41  ;;  %v1733_v0 = vsel %vm1624_vm2, %v1732_v3, %v1545_v15  ;;  %v1643_v1 = vsel %vm1626_vm3, %v1641_v53, %v1642_v51 }
 0x15b   :  { %2515 = vrot.lane.b32.xlu1 %v4019_v17, %s3741_s0  ;;  %v1676_v58 = vrot.slane %v1514_v59, 7  ;;  %v1707_v46 = vsel %vm1628_vm4, %v1704_v16, %v1706_v12  ;;  %v1734_v8 = vsel %vm1626_vm3, %v1732_v3, %v1733_v0  ;;  %v4080_v24 = vcombine.high %v4050_v44, %v5052_v63 }
 0x15c   :  { %v1644_v2 = vsel %vm1628_vm4, %v1641_v53, %v1643_v1  ;;  %v1708_v7 = vsel %vm1630_vm5, %v1704_v16, %v1707_v46  ;;  %v1735_v11 = vsel %vm1628_vm4, %v1732_v3, %v1734_v8  ;;  %v1670_v15 = vsel %vm1624_vm2, %v1669_v50, %v1511_v30  ;;  %v939_v21 = vpop.f32.mrf.mxu0  ;;  %v992_v61 = vpop.f32.mrf.mxu1 }
 0x15d   :  { %v1645_v20 = vsel %vm1630_vm5, %v1641_v53, %v1644_v2  ;;  %v1736_v25 = vsel %vm1630_vm5, %v1732_v3, %v1735_v11  ;;  %v1671_v26 = vsel %vm1626_vm3, %v1669_v50, %v1670_v15  ;;  %v1649_v35 = vsel %vm1624_vm2, %v1648_v23, %v3898_v19 }
 0x15e   :  { %v1677_v10 = vsel %vm1624_vm2, %v1676_v58, %v1513_v34  ;;  %2497 = vrot.lane.b32.xlu0 %v4055_v18, %s3741_s0  ;;  %v2254_v13 = vcombine.low %v1708_v7, %v1736_v25  ;;  %v1672_v30 = vsel %vm1628_vm4, %v1669_v50, %v1671_v26  ;;  %v1650_v27 = vsel %vm1626_vm3, %v1648_v23, %v1649_v35  ;;  %v941_v41 = vpop.f32.mrf.mxu0  ;;  %v994_v51 = vpop.f32.mrf.mxu1 }
 0x15f   :  { %2523 = vrot.lane.b32.xlu1 %v4059_v22, %s3741_s0  ;;  %v1532_v36 = vrot.slane %v3931_v28, 4  ;;  %v1673_v48 = vsel %vm1630_vm5, %v1669_v50, %v1672_v30  ;;  %v1651_v14 = vsel %vm1628_vm4, %v1648_v23, %v1650_v27  ;;  %v1678_v19 = vsel %vm1626_vm3, %v1676_v58, %v1677_v10 }
 0x160   :  { %v1548_v34 = vrot.slane %v3931_v28, 6  ;;  %v4108_v16 = vrot.slane %v2254_v13, %v3844_v5  ;;  %v2209_v53 = vcombine.low %v1645_v20, %v1673_v48  ;;  %v1652_v3 = vsel %vm1630_vm5, %v1648_v23, %v1651_v14  ;;  %v943_v35 = vpop.f32.mrf.mxu0 }
 0x161   :  { %v1679_v59 = vsel %vm1628_vm4, %v1676_v58, %v1678_v19  ;;  %v1907_v0 = vrot.slane %v1532_v36, 7  ;;  %v940_v1 = vadd.f32 %v939_v21, %v3871_v54  ;;  %v1535_v46 = vrot.slane %v3941_v40, 4 }
 0x162   :  { %v1680_v12 = vsel %vm1630_vm5, %v1676_v58, %v1679_v59  ;;  %v1935_v50 = vrot.slane %v1548_v34, 7  ;;  %2513 = vrot.lane.b32.xlu0 %v4080_v24, %s3741_s0  ;;  %v4121_v23 = vcombine.high %v4059_v22, %v5052_v63  ;;  %v4124_v8 = vrot.slane %v2209_v53, %v3844_v5 }
 0x163   :  { %2539 = vrot.lane.b32.xlu1 %v4108_v16, %s3741_s0  ;;  %v2245_v58 = vcombine.low %v1652_v3, %v1680_v12  ;;  %v1908_v2 = vsel %vm1624_vm2, %v1907_v0, %v1531_v33  ;;  %v942_v11 = vadd.f32 %v941_v41, %v3877_v56  ;;  %v1534_v20 = vrot.slane %v3933_v29, 4  ;;  %v996_v33 = vpop.f32.mrf.mxu1 }
 0x164   :  { %v1936_v7 = vsel %vm1624_vm2, %v1935_v50, %v1547_v38  ;;  %v4136_v15 = vcombine.high %v4108_v16, %v5052_v63  ;;  %v1909_v21 = vsel %vm1626_vm3, %v1907_v0, %v1908_v2  ;;  %v993_v26 = vadd.f32 %v992_v61, %v3874_v55 }
 0x165   :  { %v1937_v25 = vsel %vm1626_vm3, %v1935_v50, %v1936_v7  ;;  %v1910_v10 = vsel %vm1628_vm4, %v1907_v0, %v1909_v21  ;;  %v1079_v13 = vcombine.low %v940_v1, %v942_v11  ;;  %v1080_v30 = vcombine.high %v940_v1, %v942_v11  ;;  %v945_v1 = vpop.f32.mrf.mxu0 }
 0x166   :  { %v1938_v38 = vsel %vm1628_vm4, %v1935_v50, %v1937_v25  ;;  %2521 = vrot.lane.b32.xlu0 %v4124_v8, %s3741_s0  ;;  %v1911_v27 = vsel %vm1630_vm5, %v1907_v0, %v1910_v10  ;;  %v995_v61 = vadd.f32 %v994_v51, %v3880_v57  ;;  %v1550_v48 = vrot.slane %v3933_v29, 6  ;;  %v998_v0 = vpop.f32.mrf.mxu1 }
 0x167   :  { %2531 = vrot.lane.b32.xlu1 %v4121_v23, %s3741_s0  ;;  %v1939_v36 = vsel %vm1630_vm5, %v1935_v50, %v1938_v38  ;;  %v4152_v14 = vrot.slane %v2245_v58, %v3844_v5  ;;  %v1089_v34 = vrot.slane %v1079_v13, %v3839_v60  ;;  %v1914_v53 = vrot.slane %v1534_v20, 7 }
 0x168   :  { %v2290_v19 = vcombine.low %v1911_v27, %v1939_v36  ;;  %v1096_v3 = vrot.slane %v1080_v30, %v3839_v60  ;;  %v1081_v59 = vcombine.low %v993_v26, %v995_v61  ;;  %v1082_v41 = vcombine.high %v993_v26, %v995_v61 }
 0x169   :  { %v1942_v12 = vrot.slane %v1550_v48, 7  ;;  %v4161_v51 = vcombine.high %v4124_v8, %v5052_v63  ;;  %v1915_v58 = vsel %vm1624_vm2, %v1914_v53, %v1533_v49  ;;  %v944_v2 = vadd.f32 %v943_v35, %v3871_v54 }
 0x16a   :  { %v4157_v50 = vrot.slane %v2290_v19, %v3844_v5  ;;  %v1551_v7 = vrot.slane %v3941_v40, 6  ;;  %2537 = vrot.lane.b32.xlu0 %v4152_v14, %s3741_s0  ;;  %v1103_v11 = vrot.slane %v1081_v59, %v3839_v60  ;;  %v1110_v20 = vrot.slane %v1082_v41, %v3839_v60 }
 0x16b   :  { %2547 = vrot.lane.b32.xlu1 %v4136_v15, %s3741_s0  ;;  %v1916_v21 = vsel %vm1626_vm3, %v1914_v53, %v1915_v58  ;;  %v1943_v49 = vsel %vm1624_vm2, %v1942_v12, %v1549_v39  ;;  %v997_v25 = vadd.f32 %v996_v33, %v3874_v55  ;;  %v946_v26 = vadd.f32 %v945_v1, %v3877_v56 }
 0x16c   :  { %v999_v35 = vadd.f32 %v998_v0, %v3880_v57  ;;  %v1111_v10 = vcombine.low %v1089_v34, %v1103_v11  ;;  %v1112_v38 = vcombine.high %v1089_v34, %v1103_v11  ;;  %v1113_v13 = vcombine.low %v1096_v3, %v1110_v20 }
 0x16d   :  { %v1114_v30 = vcombine.high %v1096_v3, %v1110_v20  ;;  %v1917_v27 = vsel %vm1628_vm4, %v1914_v53, %v1916_v21  ;;  %v1944_v36 = vsel %vm1626_vm3, %v1942_v12, %v1943_v49  ;;  %v1151_v61 = vcombine.low %v944_v2, %v946_v26 }
 0x16e   :  { %v1152_v48 = vcombine.high %v944_v2, %v946_v26  ;;  %2529 = vrot.lane.b32.xlu0 %v4161_v51, %s3741_s0  ;;  %v3573_v39 = vrot.slane %v1111_v10, 9  ;;  %v3575_v33 = vrot.slane %v1112_v38, 9  ;;  %v3577_v59 = vrot.slane %v1113_v13, 9 }
 0x16f   :  { %2555 = vrot.lane.b32.xlu1 %v4157_v50, %s3741_s0  ;;  %v3579_v34 = vrot.slane %v1114_v30, 9  ;;  %v1945_v3 = vsel %vm1628_vm4, %v1942_v12, %v1944_v36  ;;  %v4191_v41 = vcombine.high %v4152_v14, %v5052_v63  ;;  %v1153_v1 = vcombine.low %v997_v25, %v999_v35 }
 0x170   :  { %v1918_v0 = vsel %vm1630_vm5, %v1914_v53, %v1917_v27  ;;  %v1161_v58 = vrot.slane %v1151_v61, %v3839_v60  ;;  %v1168_v2 = vrot.slane %v1152_v48, %v3839_v60  ;;  %v1516_v11 = vrot.slane %v3931_v28, 2 }
 0x171   :  { %v4197_v20 = vmax.f32 %v1111_v10, %v3573_v39  ;;  %v1946_v21 = vsel %vm1630_vm5, %v1942_v12, %v1945_v3  ;;  %v1154_v49 = vcombine.high %v997_v25, %v999_v35  ;;  %v1175_v26 = vrot.slane %v1153_v1, %v3839_v60 }
 0x172   :  { %v1537_v36 = vrot.slane %v3946_v43, 4  ;;  %v1553_v19 = vrot.slane %v3946_v43, 6  ;;  %v4203_v47 = vmax.f32 %v1112_v38, %v3575_v33  ;;  %v4205_v53 = vmax.f32 %v1113_v13, %v3577_v59  ;;  %2545 = vrot.lane.b32.xlu0 %v4191_v41, %s3741_s0 }
 0x173   :  { %v4209_v27 = vmax.f32 %v1114_v30, %v3579_v34  ;;  %v2326_v10 = vcombine.low %v1918_v0, %v1946_v21  ;;  %v1182_v61 = vrot.slane %v1154_v49, %v3839_v60  ;;  %v4214_v12 = vcombine.high %v4157_v50, %v5052_v63 }
 0x174   :  { %v1183_v25 = vcombine.low %v1161_v58, %v1175_v26  ;;  %v1184_v35 = vcombine.high %v1161_v58, %v1175_v26  ;;  %v1851_v48 = vrot.slane %v3931_v28, 7  ;;  %v1879_v38 = vrot.slane %v1516_v11, 7 }
 0x175   :  { %v4219_v39 = vrot.slane %v2326_v10, %v3844_v5  ;;  %v1185_v33 = vcombine.low %v1168_v2, %v1182_v61  ;;  %v1186_v30 = vcombine.high %v1168_v2, %v1182_v61  ;;  %v1518_v26 = vrot.slane %v3933_v29, 2 }
 0x176   :  { %v3581_v59 = vrot.slane %v1183_v25, 9  ;;  %v3583_v34 = vrot.slane %v1184_v35, 9  ;;  %v1852_v3 = vsel %vm1624_vm2, %v1851_v48, %v3921_v4  ;;  %v1880_v1 = vsel %vm1624_vm2, %v1879_v38, %v1515_v31 }
 0x177   :  { %2571 = vrot.lane.b32.xlu1 %v4219_v39, %s3741_s0  ;;  %v3585_v28 = vrot.slane %v1185_v33, 9  ;;  %v3587_v0 = vrot.slane %v1186_v30, 9  ;;  %v1853_v58 = vsel %vm1626_vm3, %v1851_v48, %v1852_v3  ;;  %v1881_v11 = vsel %vm1626_vm3, %v1879_v38, %v1880_v1 }
 0x178   :  { %v4230_v21 = vmax.f32 %v1183_v25, %v3581_v59  ;;  %v1854_v2 = vsel %vm1628_vm4, %v1851_v48, %v1853_v58  ;;  %v1882_v49 = vsel %vm1628_vm4, %v1879_v38, %v1881_v11  ;;  %v4242_v58 = vmax.f32 %v1184_v35, %v3583_v34 }
 0x179   :  { %v1855_v10 = vsel %vm1630_vm5, %v1851_v48, %v1854_v2  ;;  %v1883_v61 = vsel %vm1630_vm5, %v1879_v38, %v1882_v49  ;;  %v4244_v11 = vmax.f32 %v1185_v33, %v3585_v28  ;;  %v4246_v13 = vmax.f32 %v1186_v30, %v3587_v0 }
 0x17a   :  { %v2281_v59 = vcombine.low %v1855_v10, %v1883_v61  ;;  %v1858_v38 = vrot.slane %v3933_v29, 7  ;;  %v1886_v2 = vrot.slane %v1518_v26, 7  ;;  %v1536_v49 = vrot.slane %v3944_v42, 4 }
 0x17b   :  { %2563 = vrot.lane.b32.xlu1 %v4214_v12, %s3741_s0  ;;  %v4258_v35 = vcombine.high %v4219_v39, %v5052_v63  ;;  %v1552_v33 = vrot.slane %v3944_v42, 6  ;;  %v1538_v30 = vrot.slane %v3948_v52, 4  ;;  %v1554_v34 = vrot.slane %v3948_v52, 6 }
 0x17c   :  { %v4252_v48 = vrot.slane %v2281_v59, %v3844_v5  ;;  %v1859_v28 = vsel %vm1624_vm2, %v1858_v38, %v3923_v6  ;;  %v1887_v29 = vsel %vm1624_vm2, %v1886_v2, %v1517_v32  ;;  %v1921_v0 = vrot.slane %v1536_v49, 7 }
 0x17d   :  { %v1520_v26 = vrot.slane %v3944_v42, 2  ;;  %v1860_v10 = vsel %vm1626_vm3, %v1858_v38, %v1859_v28  ;;  %v1888_v61 = vsel %vm1626_vm3, %v1886_v2, %v1887_v29  ;;  %v1949_v59 = vrot.slane %v1552_v33, 7 }
 0x17e   :  { %2553 = vrot.lane.b32.xlu0 %v4252_v48, %s3741_s0  ;;  %v1928_v4 = vrot.slane %v1538_v30, 7  ;;  %v1861_v25 = vsel %vm1628_vm4, %v1858_v38, %v1860_v10  ;;  %v1889_v3 = vsel %vm1628_vm4, %v1886_v2, %v1888_v61  ;;  %v1922_v6 = vsel %vm1624_vm2, %v1921_v0, %v1535_v46 }
 0x17f   :  { %2579 = vrot.lane.b32.xlu1 %v4258_v35, %s3741_s0  ;;  %v1956_v32 = vrot.slane %v1554_v34, 7  ;;  %v1862_v49 = vsel %vm1630_vm5, %v1858_v38, %v1861_v25  ;;  %v1890_v1 = vsel %vm1630_vm5, %v1886_v2, %v1889_v3  ;;  %v1923_v31 = vsel %vm1626_vm3, %v1921_v0, %v1922_v6  ;;  %v949_v34 = vpop.f32.mrf.mxu0 }
 0x180   :  { %v1950_v33 = vsel %vm1624_vm2, %v1949_v59, %v1551_v7  ;;  %v2317_v30 = vcombine.low %v1862_v49, %v1890_v1  ;;  %v1924_v28 = vsel %vm1628_vm4, %v1921_v0, %v1923_v31  ;;  %v1929_v46 = vsel %vm1624_vm2, %v1928_v4, %v1537_v36 }
 0x181   :  { %v1951_v29 = vsel %vm1626_vm3, %v1949_v59, %v1950_v33  ;;  %v1925_v25 = vsel %vm1630_vm5, %v1921_v0, %v1924_v28  ;;  %v1930_v38 = vsel %vm1626_vm3, %v1928_v4, %v1929_v46  ;;  %v1957_v7 = vsel %vm1624_vm2, %v1956_v32, %v1553_v19  ;;  %v1002_v46 = vpop.f32.mrf.mxu1 }
 0x182   :  { %v1952_v3 = vsel %vm1628_vm4, %v1949_v59, %v1951_v29  ;;  %v4298_v1 = vrot.slane %v2317_v30, %v3844_v5  ;;  %v1931_v2 = vsel %vm1628_vm4, %v1928_v4, %v1930_v38  ;;  %v1958_v36 = vsel %vm1626_vm3, %v1956_v32, %v1957_v7  ;;  %v951_v30 = vpop.f32.mrf.mxu0 }
 0x183   :  { %v1953_v31 = vsel %vm1630_vm5, %v1949_v59, %v1952_v3  ;;  %v1932_v0 = vsel %vm1630_vm5, %v1928_v4, %v1931_v2  ;;  %v1959_v61 = vsel %vm1628_vm4, %v1956_v32, %v1958_v36  ;;  %v1865_v6 = vrot.slane %v3944_v42, 7 }
 0x184   :  { %5076 = vst [vmem:[#allocation12_spill] sm:$0xff] %v4298_v1  ;;  %v2362_v10 = vcombine.low %v1925_v25, %v1953_v31  ;;  %2569 = vrot.lane.b32.xlu0 %v4298_v1, %s3741_s0  ;;  %v4311_v19 = vcombine.high %v4252_v48, %v5052_v63  ;;  %v1960_v59 = vsel %vm1630_vm5, %v1956_v32, %v1959_v61  ;;  %v1893_v33 = vrot.slane %v1520_v26, 7  ;;  %v953_v61 = vpop.f32.mrf.mxu0 }
 0x185   :  { %v2398_v4 = vcombine.low %v1932_v0, %v1960_v59  ;;  %v4319_v42 = vcombine.high %v4298_v1, %v5052_v63  ;;  %v1866_v29 = vsel %vm1624_vm2, %v1865_v6, %v3941_v40  ;;  %v5079_v3 = vrot.slane %v3941_v40, 2 }
 0x186   :  { %v4315_v28 = vrot.slane %v2362_v10, %v3844_v5  ;;  %v1867_v25 = vsel %vm1626_vm3, %v1865_v6, %v1866_v29  ;;  %v1522_v26 = vrot.slane %v3948_v52, 2  ;;  %v1872_v38 = vrot.slane %v3948_v52, 7 }
 0x187   :  { %5078 = vst [vmem:[#allocation14_spill] sm:$0xff] %v4319_v42  ;;  %v1894_v32 = vsel %vm1624_vm2, %v1893_v33, %v5079_v3  ;;  %v1868_v7 = vsel %vm1628_vm4, %v1865_v6, %v1867_v25  ;;  %v950_v2 = vadd.f32 %v949_v34, %v3871_v54  ;;  %v1003_v36 = vadd.f32 %v1002_v46, %v3874_v55  ;;  %v1004_v25 = vpop.f32.mrf.mxu1 }
 0x188   :  { %5077 = vst [vmem:[#allocation13_spill] sm:$0xff] %v4315_v28  ;;  %2587 = vrot.lane.b32.xlu1 %v4315_v28, %s3741_s0  ;;  %v1895_v31 = vsel %vm1626_vm3, %v1893_v33, %v1894_v32  ;;  %2561 = vrot.lane.b32.xlu0 %v4311_v19, %s3741_s0  ;;  %v1869_v40 = vsel %vm1630_vm5, %v1865_v6, %v1868_v7  ;;  %v1900_v0 = vrot.slane %v1522_v26, 7  ;;  %v5081_v32 = vrot.slane %v3946_v43, 2 }
 0x189   :  { %v1896_v10 = vsel %vm1628_vm4, %v1893_v33, %v1895_v31  ;;  %v1873_v52 = vsel %vm1624_vm2, %v1872_v38, %v3946_v43  ;;  %v4342_v59 = vrot.slane %v2398_v4, %v3844_v5  ;;  %v952_v46 = vadd.f32 %v951_v30, %v3877_v56 }
 0x18a   :  { %v1897_v29 = vsel %vm1630_vm5, %v1893_v33, %v1896_v10  ;;  %v1874_v34 = vsel %vm1626_vm3, %v1872_v38, %v1873_v52  ;;  %v1901_v7 = vsel %vm1624_vm2, %v1900_v0, %v5081_v32  ;;  %v1005_v26 = vadd.f32 %v1004_v25, %v3880_v57 }
 0x18b   :  { %5080 = vst [vmem:[#allocation15_spill] sm:$0xff] %v4342_v59  ;;  %v2353_v3 = vcombine.low %v1869_v40, %v1897_v29  ;;  %v1875_v6 = vsel %vm1628_vm4, %v1872_v38, %v1874_v34  ;;  %v1902_v33 = vsel %vm1626_vm3, %v1900_v0, %v1901_v7  ;;  %v1223_v31 = vcombine.low %v950_v2, %v952_v46  ;;  %v955_v29 = vpop.f32.mrf.mxu0 }
 0x18c   :  { %2603 = vrot.lane.b32.xlu1 %v4342_v59, %s3741_s0  ;;  %v1876_v4 = vsel %vm1630_vm5, %v1872_v38, %v1875_v6  ;;  %v1224_v10 = vcombine.high %v950_v2, %v952_v46  ;;  %2577 = vrot.lane.b32.xlu0 %v4319_v42, %s3741_s0  ;;  %v4360_v30 = vcombine.high %v4315_v28, %v5052_v63 }
 0x18d   :  { %v1903_v43 = vsel %vm1628_vm4, %v1900_v0, %v1902_v33  ;;  %v1225_v40 = vcombine.low %v1003_v36, %v1005_v26  ;;  %v1226_v52 = vcombine.high %v1003_v36, %v1005_v26  ;;  %v1233_v38 = vrot.slane %v1223_v31, %v3839_v60  ;;  %v1006_v31 = vpop.f32.mrf.mxu1 }
 0x18e   :  { %5082 = vst [vmem:[#allocation16_spill] sm:$0xff] %v4360_v30  ;;  %v1904_v34 = vsel %vm1630_vm5, %v1900_v0, %v1903_v43  ;;  %v1240_v25 = vrot.slane %v1224_v10, %v3839_v60  ;;  %v954_v2 = vadd.f32 %v953_v61, %v3871_v54  ;;  %v4368_v46 = vrot.slane %v2353_v3, %v3844_v5 }
 0x18f   :  { %v2389_v6 = vcombine.low %v1876_v4, %v1904_v34  ;;  %v1247_v32 = vrot.slane %v1225_v40, %v3839_v60  ;;  %v1254_v7 = vrot.slane %v1226_v52, %v3839_v60  ;;  %v4376_v36 = vcombine.high %v4342_v59, %v5052_v63 }
 0x190   :  { %5083 = vst [vmem:[#allocation17_spill] sm:$0xff] %v4368_v46  ;;  %2595 = vrot.lane.b32.xlu1 %v4360_v30, %s3741_s0  ;;  %v1572_v0 = vrot.slane %v4203_v47, 2  ;;  %v1739_v26 = vrot.slane %v4203_v47, 7  ;;  %v956_v54 = vadd.f32 %v955_v29, %v3877_v56  ;;  %2585 = vrot.lane.b32.xlu0 %v4368_v46, %s3741_s0 }
 0x191   :  { %5084 = vst [vmem:[#allocation18_spill] sm:$0xff] %v4376_v36  ;;  %v4384_v61 = vrot.slane %v2389_v6, %v3844_v5  ;;  %v1255_v3 = vcombine.low %v1233_v38, %v1247_v32  ;;  %v1256_v4 = vcombine.high %v1233_v38, %v1247_v32  ;;  %v1257_v33 = vcombine.low %v1240_v25, %v1254_v7 }
 0x192   :  { %v1258_v10 = vcombine.high %v1240_v25, %v1254_v7  ;;  %v1740_v43 = vsel %vm1624_vm2, %v1739_v26, %v4197_v20  ;;  %v1767_v40 = vrot.slane %v1572_v0, 7  ;;  %v1295_v52 = vcombine.low %v954_v2, %v956_v54 }
 0x193   :  { %5085 = vst [vmem:[#allocation19_spill] sm:$0xff] %v4384_v61  ;;  %v3589_v34 = vrot.slane %v1255_v3, 9  ;;  %v3591_v49 = vrot.slane %v1256_v4, 9  ;;  %v3593_v63 = vrot.slane %v1257_v33, 9  ;;  %v1741_v56 = vsel %vm1626_vm3, %v1739_v26, %v1740_v43 }
 0x194   :  { %2611 = vrot.lane.b32.xlu1 %v4376_v36, %s3741_s0  ;;  %v3595_v29 = vrot.slane %v1258_v10, 9  ;;  %v1742_v6 = vsel %vm1628_vm4, %v1739_v26, %v1741_v56  ;;  %v5086_v38 = vrot.slane %v4197_v20, 2  ;;  %v1296_v32 = vcombine.high %v954_v2, %v956_v54  ;;  %2601 = vrot.lane.b32.xlu0 %v4384_v61, %s3741_s0  ;;  %v1008_v36 = vpop.f32.mrf.mxu1 }
 0x195   :  { %v4400_v43 = vmax.f32 %v1255_v3, %v3589_v34  ;;  %v1007_v56 = vadd.f32 %v1006_v31, %v3874_v55  ;;  %v4409_v54 = vmax.f32 %v1256_v4, %v3591_v49  ;;  %v4411_v7 = vmax.f32 %v1257_v33, %v3593_v63 }
 0x196   :  { %v1768_v25 = vsel %vm1624_vm2, %v1767_v40, %v5086_v38  ;;  %v5087_v38 = vmov 0.0   ;;  %v4413_v0 = vmax.f32 %v1258_v10, %v3595_v29  ;;  %v1743_v3 = vsel %vm1630_vm5, %v1739_v26, %v1742_v6 }
 0x197   :  { %v1769_v30 = vsel %vm1626_vm3, %v1767_v40, %v1768_v25  ;;  %v4407_v2 = vcombine.high %v4368_v46, %v5087_v38  ;;  %v1305_v28 = vrot.slane %v1295_v52, %v3839_v60  ;;  %v1312_v55 = vrot.slane %v1296_v32, %v3839_v60 }
 0x198   :  { %v1770_v34 = vsel %vm1628_vm4, %v1767_v40, %v1769_v30  ;;  %v1009_v31 = vadd.f32 %v1008_v36, %v3880_v57  ;;  %v1588_v63 = vrot.slane %v4203_v47, 4  ;;  %v1604_v49 = vrot.slane %v4203_v47, 6 }
 0x199   :  { %5088 = vst [vmem:[#allocation20_spill] sm:$0xff] %v4407_v2  ;;  %v1771_v59 = vsel %vm1630_vm5, %v1767_v40, %v1770_v34  ;;  %2593 = vrot.lane.b32.xlu0 %v4407_v2, %s3741_s0  ;;  %v1590_v33 = vrot.slane %v4209_v27, 4  ;;  %v4429_v57 = vcombine.high %v4384_v61, %v5087_v38  ;;  %v1606_v36 = vrot.slane %v4209_v27, 6 }
 0x19a   :  { %v2155_v26 = vcombine.low %v1743_v3, %v1771_v59  ;;  %v1297_v4 = vcombine.low %v1007_v56, %v1009_v31  ;;  %v1298_v30 = vcombine.high %v1007_v56, %v1009_v31  ;;  %v1795_v10 = vrot.slane %v1588_v63, 7 }
 0x19b   :  { %v1823_v52 = vrot.slane %v1604_v49, 7  ;;  %5089 = vst [vmem:[#allocation21_spill] sm:$0xff] %v4429_v57  ;;  %v1802_v59 = vrot.slane %v1590_v33, 7  ;;  %v5090_v32 = vrot.slane %v4197_v20, 4  ;;  %v5091_v3 = vrot.slane %v4197_v20, 6 }
 0x19c   :  { %v4433_v40 = vrot.slane %v2155_v26, %v3844_v5  ;;  %v1319_v29 = vrot.slane %v1297_v4, %v3839_v60  ;;  %v1326_v47 = vrot.slane %v1298_v30, %v3839_v60  ;;  %v1830_v31 = vrot.slane %v1606_v36, 7 }
 0x19d   :  { %v1796_v56 = vsel %vm1624_vm2, %v1795_v10, %v5090_v32  ;;  %v1824_v34 = vsel %vm1624_vm2, %v1823_v52, %v5091_v3  ;;  %2609 = vrot.lane.b32.xlu0 %v4429_v57, %s3741_s0  ;;  %v5092_v32 = vrot.slane %v4205_v53, 4  ;;  %v5093_v3 = vrot.slane %v4205_v53, 6 }
 0x19e   :  { %2493 = vrot.lane.b32.xlu1 %v4433_v40, %s3741_s0  ;;  %v1327_v63 = vcombine.low %v1305_v28, %v1319_v29  ;;  %v1328_v49 = vcombine.high %v1305_v28, %v1319_v29  ;;  %v1329_v26 = vcombine.low %v1312_v55, %v1326_v47  ;;  %v1330_v4 = vcombine.high %v1312_v55, %v1326_v47 }
 0x19f   :  { %v1797_v30 = vsel %vm1626_vm3, %v1795_v10, %v1796_v56  ;;  %v1825_v33 = vsel %vm1626_vm3, %v1823_v52, %v1824_v34  ;;  %v1803_v20 = vsel %vm1624_vm2, %v1802_v59, %v5092_v32  ;;  %v1831_v6 = vsel %vm1624_vm2, %v1830_v31, %v5093_v3 }
 0x1a0   :  { %v3597_v36 = vrot.slane %v1327_v63, 9  ;;  %v3599_v25 = vrot.slane %v1328_v49, 9  ;;  %v3601_v57 = vrot.slane %v1329_v26, 9  ;;  %v3603_v61 = vrot.slane %v1330_v4, 9 }
 0x1a1   :  { %v1798_v28 = vsel %vm1628_vm4, %v1795_v10, %v1797_v30  ;;  %v1826_v55 = vsel %vm1628_vm4, %v1823_v52, %v1825_v33  ;;  %v1804_v29 = vsel %vm1626_vm3, %v1802_v59, %v1803_v20  ;;  %v1832_v47 = vsel %vm1626_vm3, %v1830_v31, %v1831_v6 }
 0x1a2   :  { %v1574_v32 = vrot.slane %v4209_v27, 2  ;;  %v1746_v3 = vrot.slane %v4209_v27, 7  ;;  %v1799_v46 = vsel %vm1630_vm5, %v1795_v10, %v1798_v28  ;;  %v1827_v2 = vsel %vm1630_vm5, %v1823_v52, %v1826_v55 }
 0x1a3   :  { %v1805_v30 = vsel %vm1628_vm4, %v1802_v59, %v1804_v29  ;;  %v1833_v33 = vsel %vm1628_vm4, %v1830_v31, %v1832_v47  ;;  %v1611_v20 = vrot.slane %v4400_v43, 6  ;;  %v4470_v42 = vmax.f32 %v1327_v63, %v3597_v36 }
 0x1a4   :  { %v4472_v56 = vmax.f32 %v1328_v49, %v3599_v25  ;;  %v4474_v34 = vmax.f32 %v1329_v26, %v3601_v57  ;;  %v4476_v1 = vmax.f32 %v1330_v4, %v3603_v61  ;;  %v2164_v27 = vcombine.low %v1799_v46, %v1827_v2 }
 0x1a5   :  { %v1806_v10 = vsel %vm1630_vm5, %v1802_v59, %v1805_v30  ;;  %v1834_v28 = vsel %vm1630_vm5, %v1830_v31, %v1833_v33  ;;  %v1747_v55 = vsel %vm1624_vm2, %v1746_v3, %v4205_v53  ;;  %v1774_v29 = vrot.slane %v1574_v32, 7 }
 0x1a6   :  { %v4484_v63 = vrot.slane %v2164_v27, %v3844_v5  ;;  %v2200_v25 = vcombine.low %v1806_v10, %v1834_v28  ;;  %v1748_v57 = vsel %vm1626_vm3, %v1746_v3, %v1747_v55  ;;  %v1592_v61 = vrot.slane %v4242_v58, 4 }
 0x1a7   :  { %v1749_v46 = vsel %vm1628_vm4, %v1746_v3, %v1748_v57  ;;  %v5094_v2 = vrot.slane %v4205_v53, 2  ;;  %v1608_v31 = vrot.slane %v4242_v58, 6  ;;  %v1576_v49 = vrot.slane %v4242_v58, 2 }
 0x1a8   :  { %2495 = vrot.lane.b32.xlu1 %v4484_v63, %s3741_s0  ;;  %v1750_v4 = vsel %vm1630_vm5, %v1746_v3, %v1749_v46  ;;  %v4501_v47 = vcombine.high %v4433_v40, %v5087_v38  ;;  %v1809_v32 = vrot.slane %v1592_v61, 7  ;;  %v1753_v33 = vrot.slane %v4242_v58, 7 }
 0x1a9   :  { %v1775_v59 = vsel %vm1624_vm2, %v1774_v29, %v5094_v2  ;;  %v1837_v30 = vrot.slane %v1608_v31, 7  ;;  %v4506_v27 = vrot.slane %v2200_v25, %v3844_v5  ;;  %v1781_v28 = vrot.slane %v1576_v49, 7 }
 0x1aa   :  { %v1776_v36 = vsel %vm1626_vm3, %v1774_v29, %v1775_v59  ;;  %v1594_v3 = vrot.slane %v4246_v13, 4  ;;  %v5095_v57 = vrot.slane %v4230_v21, 4  ;;  %v5096_v2 = vrot.slane %v4230_v21, 6 }
 0x1ab   :  { %v1777_v53 = vsel %vm1628_vm4, %v1774_v29, %v1776_v36  ;;  %v1754_v58 = vsel %vm1624_vm2, %v1753_v33, %v4230_v21  ;;  %v5097_v31 = vrot.slane %v4230_v21, 2 }
 0x1ac   :  { %v1778_v10 = vsel %vm1630_vm5, %v1774_v29, %v1777_v53  ;;  %v1810_v46 = vsel %vm1624_vm2, %v1809_v32, %v5095_v57  ;;  %v1838_v61 = vsel %vm1624_vm2, %v1837_v30, %v5096_v2  ;;  %2511 = vrot.lane.b32.xlu1 %v4506_v27, %s3741_s0  ;;  %v1755_v59 = vsel %vm1626_vm3, %v1753_v33, %v1754_v58 }
 0x1ad   :  { %v2191_v55 = vcombine.low %v1750_v4, %v1778_v10  ;;  %v1811_v29 = vsel %vm1626_vm3, %v1809_v32, %v1810_v46  ;;  %v1839_v25 = vsel %vm1626_vm3, %v1837_v30, %v1838_v61  ;;  %v1782_v49 = vsel %vm1624_vm2, %v1781_v28, %v5097_v31 }
 0x1ae   :  { %v1812_v36 = vsel %vm1628_vm4, %v1809_v32, %v1811_v29  ;;  %v1840_v53 = vsel %vm1628_vm4, %v1837_v30, %v1839_v25  ;;  %v1756_v10 = vsel %vm1628_vm4, %v1753_v33, %v1755_v59  ;;  %v4534_v57 = vcombine.high %v4484_v63, %v5087_v38 }
 0x1af   :  { %v4527_v4 = vrot.slane %v2191_v55, %v3844_v5  ;;  %v1813_v46 = vsel %vm1630_vm5, %v1809_v32, %v1812_v36  ;;  %v1841_v2 = vsel %vm1630_vm5, %v1837_v30, %v1840_v53  ;;  %v1783_v21 = vsel %vm1626_vm3, %v1781_v28, %v1782_v49 }
 0x1b0   :  { %v2236_v55 = vcombine.low %v1813_v46, %v1841_v2  ;;  %v1757_v61 = vsel %vm1630_vm5, %v1753_v33, %v1756_v10  ;;  %v1784_v58 = vsel %vm1628_vm4, %v1781_v28, %v1783_v21  ;;  %v1610_v29 = vrot.slane %v4246_v13, 6  ;;  %2503 = vrot.lane.b32.xlu1 %v4534_v57, %s3741_s0 }
 0x1b1   :  { %5098 = vst [vmem:[#allocation22_spill] sm:$0xff] %v4527_v4  ;;  %2509 = vrot.lane.b32.xlu0 %v4527_v4, %s3741_s0  ;;  %v1785_v25 = vsel %vm1630_vm5, %v1781_v28, %v1784_v58  ;;  %v1816_v32 = vrot.slane %v1594_v3, 7  ;;  %v1578_v30 = vrot.slane %v4246_v13, 2  ;;  %v1760_v59 = vrot.slane %v4246_v13, 7 }
 0x1b2   :  { %v4551_v31 = vcombine.high %v4506_v27, %v5087_v38  ;;  %v4554_v33 = vrot.slane %v2236_v55, %v3844_v5  ;;  %v2227_v49 = vcombine.low %v1757_v61, %v1785_v25  ;;  %v1844_v36 = vrot.slane %v1610_v29, 7 }
 0x1b3   :  { %v5100_v53 = vrot.slane %v4244_v11, 4  ;;  %v1761_v28 = vsel %vm1624_vm2, %v1760_v59, %v4244_v11  ;;  %v1788_v3 = vrot.slane %v1578_v30, 7  ;;  %v1596_v46 = vrot.slane %v4409_v54, 4 }
 0x1b4   :  { %5099 = vst [vmem:[#allocation23_spill] sm:$0xff] %v4554_v33  ;;  %v5101_v2 = vrot.slane %v4244_v11, 6  ;;  %v1762_v55 = vsel %vm1626_vm3, %v1760_v59, %v1761_v28  ;;  %v1612_v61 = vrot.slane %v4409_v54, 6  ;;  %2519 = vrot.lane.b32.xlu1 %v4551_v31, %s3741_s0  ;;  %v5102_v30 = vrot.slane %v4244_v11, 2 }
 0x1b5   :  { %v1817_v10 = vsel %vm1624_vm2, %v1816_v32, %v5100_v53  ;;  %2501 = vrot.lane.b32.xlu0 %v4501_v47, %s3741_s0  ;;  %v1763_v25 = vsel %vm1628_vm4, %v1760_v59, %v1762_v55 }
 0x1b6   :  { %v1818_v13 = vsel %vm1626_vm3, %v1816_v32, %v1817_v10  ;;  %v1845_v21 = vsel %vm1624_vm2, %v1844_v36, %v5101_v2  ;;  %v1789_v53 = vsel %vm1624_vm2, %v1788_v3, %v5102_v30  ;;  %v4580_v10 = vcombine.high %v4527_v4, %v5087_v38 }
 0x1b7   :  { %v1819_v58 = vsel %vm1628_vm4, %v1816_v32, %v1818_v13  ;;  %v1846_v29 = vsel %vm1626_vm3, %v1844_v36, %v1845_v21  ;;  %v1790_v26 = vsel %vm1626_vm3, %v1788_v3, %v1789_v53  ;;  %v4586_v13 = vrot.slane %v2227_v49, %v3844_v5 }
 0x1b8   :  { %5103 = vst [vmem:[#allocation24_spill] sm:$0xff] %v4580_v10  ;;  %v1820_v28 = vsel %vm1630_vm5, %v1816_v32, %v1819_v58  ;;  %v1847_v2 = vsel %vm1628_vm4, %v1844_v36, %v1846_v29  ;;  %v1764_v55 = vsel %vm1630_vm5, %v1760_v59, %v1763_v25  ;;  %v1791_v11 = vsel %vm1628_vm4, %v1788_v3, %v1790_v26 }
 0x1b9   :  { %5104 = vst [vmem:[#allocation25_spill] sm:$0xff] %v4586_v13  ;;  %v1848_v21 = vsel %vm1630_vm5, %v1844_v36, %v1847_v2  ;;  %2517 = vrot.lane.b32.xlu0 %v4580_v10, %s3741_s0  ;;  %v1792_v52 = vsel %vm1630_vm5, %v1788_v3, %v1791_v11  ;;  %v2019_v32 = vrot.slane %v1596_v46, 7  ;;  %v2047_v58 = vrot.slane %v1612_v61, 7  ;;  %2527 = vrot.lane.b32.xlu1 %v4554_v33, %s3741_s0 }
 0x1ba   :  { %v2272_v30 = vcombine.low %v1820_v28, %v1848_v21  ;;  %v2263_v29 = vcombine.low %v1764_v55, %v1792_v52  ;;  %v4598_v49 = vcombine.high %v4554_v33, %v5087_v38  ;;  %v1580_v59 = vrot.slane %v4409_v54, 2 }
 0x1bb   :  { %v1963_v26 = vrot.slane %v4409_v54, 7  ;;  %v5107_v25 = vrot.slane %v4400_v43, 4  ;;  %v2048_v46 = vsel %vm1624_vm2, %v2047_v58, %v1611_v20  ;;  %v1598_v52 = vrot.slane %v4413_v0, 4 }
 0x1bc   :  { %5105 = vst [vmem:[#allocation26_spill] sm:$0xff] %v4598_v49  ;;  %v4603_v36 = vrot.slane %v2272_v30, %v3844_v5  ;;  %v2049_v53 = vsel %vm1626_vm3, %v2047_v58, %v2048_v46  ;;  %v1614_v28 = vrot.slane %v4413_v0, 6  ;;  %v4621_v2 = vcombine.high %v4586_v13, %v5087_v38 }
 0x1bd   :  { %v2020_v3 = vsel %vm1624_vm2, %v2019_v32, %v5107_v25  ;;  %v1964_v54 = vsel %vm1624_vm2, %v1963_v26, %v4400_v43  ;;  %2525 = vrot.lane.b32.xlu0 %v4586_v13, %s3741_s0  ;;  %v2050_v21 = vsel %vm1628_vm4, %v2047_v58, %v2049_v53  ;;  %v4629_v11 = vrot.slane %v2263_v29, %v3844_v5 }
 0x1be   :  { %5106 = vst [vmem:[#allocation27_spill] sm:$0xff] %v4603_v36  ;;  %v2021_v61 = vsel %vm1626_vm3, %v2019_v32, %v2020_v3  ;;  %5108 = vst [vmem:[#allocation28_spill] sm:$0xff] %v4621_v2  ;;  %v1965_v55 = vsel %vm1626_vm3, %v1963_v26, %v1964_v54  ;;  %2543 = vrot.lane.b32.xlu1 %v4603_v36, %s3741_s0  ;;  %v2051_v25 = vsel %vm1630_vm5, %v2047_v58, %v2050_v21 }
 0x1bf   :  { %v2022_v20 = vsel %vm1628_vm4, %v2019_v32, %v2021_v61  ;;  %5109 = vst [vmem:[#allocation29_spill] sm:$0xff] %v4629_v11  ;;  %v1966_v3 = vsel %vm1628_vm4, %v1963_v26, %v1965_v55  ;;  %v4636_v46 = vcombine.high %v4603_v36, %v5087_v38  ;;  %v1991_v53 = vrot.slane %v1580_v59, 7 }
 0x1c0   :  { %v2023_v30 = vsel %vm1630_vm5, %v2019_v32, %v2022_v20  ;;  %v2026_v6 = vrot.slane %v1598_v52, 7  ;;  %v1967_v54 = vsel %vm1630_vm5, %v1963_v26, %v1966_v3  ;;  %v2054_v13 = vrot.slane %v1614_v28, 7 }
 0x1c1   :  { %5110 = vst [vmem:[#allocation30_spill] sm:$0xff] %v4636_v46  ;;  %v2308_v61 = vcombine.low %v2023_v30, %v2051_v25  ;;  %v1582_v33 = vrot.slane %v4413_v0, 2  ;;  %v1970_v29 = vrot.slane %v4413_v0, 7  ;;  %2541 = vrot.lane.b32.xlu0 %v4629_v11, %s3741_s0  ;;  %v5111_v32 = vrot.slane %v4400_v43, 2 }
 0x1c2   :  { %v5112_v20 = vrot.slane %v4411_v7, 4  ;;  %v1600_v59 = vrot.slane %v4472_v56, 4  ;;  %v1616_v26 = vrot.slane %v4472_v56, 6  ;;  %2535 = vrot.lane.b32.xlu1 %v4598_v49, %s3741_s0  ;;  %v5113_v28 = vrot.slane %v4411_v7, 6  ;;  %v4660_v30 = vpop.permute.xlu1 %2507 }
 0x1c3   :  { %v1992_v58 = vsel %vm1624_vm2, %v1991_v53, %v5111_v32  ;;  %v1971_v55 = vsel %vm1624_vm2, %v1970_v29, %v4411_v7  ;;  %v1583_v10 = vrot.slane %v4470_v42, 2 }
 0x1c4   :  { %v2027_v21 = vsel %vm1624_vm2, %v2026_v6, %v5112_v20  ;;  %v1993_v0 = vsel %vm1626_vm3, %v1991_v53, %v1992_v58  ;;  %v2055_v43 = vsel %vm1624_vm2, %v2054_v13, %v5113_v28  ;;  %v1972_v20 = vsel %vm1626_vm3, %v1970_v29, %v1971_v55  ;;  %v4670_v49 = vpop.permute.xlu0 %2489 }
 0x1c5   :  { %v2028_v52 = vsel %vm1626_vm3, %v2026_v6, %v2027_v21  ;;  %v1994_v25 = vsel %vm1628_vm4, %v1991_v53, %v1993_v0  ;;  %v2056_v32 = vsel %vm1626_vm3, %v2054_v13, %v2055_v43  ;;  %v1973_v28 = vsel %vm1628_vm4, %v1970_v29, %v1972_v20  ;;  %2533 = vrot.lane.b32.xlu0 %v4621_v2, %s3741_s0 }
 0x1c6   :  { %v2029_v3 = vsel %vm1628_vm4, %v2026_v6, %v2028_v52  ;;  %v1995_v58 = vsel %vm1630_vm5, %v1991_v53, %v1994_v25  ;;  %v2057_v36 = vsel %vm1628_vm4, %v2054_v13, %v2056_v32  ;;  %v4677_v0 = vcombine.high %v4629_v11, %v5087_v38  ;;  %2551 = vrot.lane.b32.xlu1 %v4636_v46, %s3741_s0 }
 0x1c7   :  { %v2030_v21 = vsel %vm1630_vm5, %v2026_v6, %v2029_v3  ;;  %v2058_v52 = vsel %vm1630_vm5, %v2054_v13, %v2057_v36  ;;  %v1998_v53 = vrot.slane %v1582_v33, 7  ;;  %v4683_v6 = vrot.slane %v2308_v61, %v3844_v5 }
 0x1c8   :  { %5114 = vst [vmem:[#allocation31_spill] sm:$0xff] %v4677_v0  ;;  %v2299_v43 = vcombine.low %v1967_v54, %v1995_v58  ;;  %v2033_v55 = vrot.slane %v1600_v59, 7  ;;  %v2061_v25 = vrot.slane %v1616_v26, 7  ;;  %v2344_v3 = vcombine.low %v2030_v21, %v2058_v52 }
 0x1c9   :  { %5115 = vst [vmem:[#allocation32_spill] sm:$0xff] %v4683_v6  ;;  %v1974_v32 = vsel %vm1630_vm5, %v1970_v29, %v1973_v28  ;;  %v5116_v20 = vrot.slane %v4411_v7, 2  ;;  %v1977_v2 = vrot.slane %v4472_v56, 7  ;;  %v5117_v13 = vrot.slane %v4470_v42, 4  ;;  %v4698_v26 = vpop.permute.xlu1 %2499  ;;  %v4700_v29 = vpop.permute.xlu0 %2491  ;;  %2549 = vrot.lane.b32.xlu0 %v4677_v0, %s3741_s0 }
 0x1ca   :  { %v5118_v61 = vrot.slane %v4470_v42, 6  ;;  %v1584_v59 = vrot.slane %v4472_v56, 2  ;;  %v1585_v7 = vrot.slane %v4474_v34, 2  ;;  %2559 = vrot.lane.b32.xlu1 %v4683_v6, %s3741_s0  ;;  %v4711_v56 = vrot.slane %v2299_v43, %v3844_v5 }
 0x1cb   :  { %v1999_v11 = vsel %vm1624_vm2, %v1998_v53, %v5116_v20  ;;  %v2034_v36 = vsel %vm1624_vm2, %v2033_v55, %v5117_v13  ;;  %v4722_v0 = vrot.slane %v2344_v3, %v3844_v5 }
 0x1cc   :  { %v2000_v33 = vsel %vm1626_vm3, %v1998_v53, %v1999_v11  ;;  %v2062_v54 = vsel %vm1624_vm2, %v2061_v25, %v5118_v61  ;;  %v2035_v58 = vsel %vm1626_vm3, %v2033_v55, %v2034_v36  ;;  %5119 = vst [vmem:[#allocation33_spill] sm:$0xff] %v4711_v56  ;;  %v1978_v36 = vsel %vm1624_vm2, %v1977_v2, %v4470_v42 }
 0x1cd   :  { %v2001_v11 = vsel %vm1628_vm4, %v1998_v53, %v2000_v33  ;;  %v2063_v21 = vsel %vm1626_vm3, %v2061_v25, %v2062_v54  ;;  %v2036_v52 = vsel %vm1628_vm4, %v2033_v55, %v2035_v58  ;;  %v1601_v54 = vrot.slane %v4474_v34, 4  ;;  %v4725_v58 = vpop.permute.xlu0 %2505  ;;  %2557 = vrot.lane.b32.xlu0 %v4711_v56, %s3741_s0 }
 0x1ce   :  { %v2002_v28 = vsel %vm1630_vm5, %v1998_v53, %v2001_v11  ;;  %v2064_v20 = vsel %vm1628_vm4, %v2061_v25, %v2063_v21  ;;  %v2037_v61 = vsel %vm1630_vm5, %v2033_v55, %v2036_v52  ;;  %v1979_v43 = vsel %vm1626_vm3, %v1977_v2, %v1978_v36  ;;  %v2516_v11 = vpop.permute.xlu1 %2515  ;;  %2575 = vrot.lane.b32.xlu1 %v4722_v0, %s3741_s0 }
 0x1cf   :  { %v2335_v13 = vcombine.low %v1974_v32, %v2002_v28  ;;  %v2065_v33 = vsel %vm1630_vm5, %v2061_v25, %v2064_v20  ;;  %v2005_v53 = vrot.slane %v1584_v59, 7  ;;  %v1617_v32 = vrot.slane %v4474_v34, 6 }
 0x1d0   :  { %v4732_v55 = vcombine.high %v4683_v6, %v5087_v38  ;;  %v1980_v42 = vsel %vm1628_vm4, %v1977_v2, %v1979_v43  ;;  %v1602_v25 = vrot.slane %v4476_v1, 4  ;;  %v4740_v3 = vcombine.high %v4711_v56, %v5087_v38 }
 0x1d1   :  { %v2380_v59 = vcombine.low %v2037_v61, %v2065_v33  ;;  %v2006_v21 = vsel %vm1624_vm2, %v2005_v53, %v1583_v10  ;;  %v1618_v28 = vrot.slane %v4476_v1, 6  ;;  %v4745_v52 = vrot.slane %v2335_v13, %v3844_v5  ;;  %v2498_v10 = vpop.permute.xlu0 %2497 }
 0x1d2   :  { %v2007_v20 = vsel %vm1626_vm3, %v2005_v53, %v2006_v21  ;;  %v2040_v36 = vrot.slane %v1602_v25, 7  ;;  %v1586_v43 = vrot.slane %v4476_v1, 2  ;;  %v1981_v6 = vsel %vm1630_vm5, %v1977_v2, %v1980_v42  ;;  %v4752_v61 = vpop.permute.xlu1 %2523  ;;  %2567 = vrot.lane.b32.xlu1 %v4732_v55, %s3741_s0 }
 0x1d3   :  { %v2008_v46 = vsel %vm1628_vm4, %v2005_v53, %v2007_v20  ;;  %v2068_v4 = vrot.slane %v1618_v28, 7  ;;  %v1984_v56 = vrot.slane %v4476_v1, 7  ;;  %2573 = vrot.lane.b32.xlu0 %v4745_v52, %s3741_s0  ;;  %v2686_v21 = vmax.f32 %v4033_v9, %v4698_v26 }
 0x1d4   :  { %v2009_v13 = vsel %vm1630_vm5, %v2005_v53, %v2008_v46  ;;  %v2041_v33 = vsel %vm1624_vm2, %v2040_v36, %v1601_v54  ;;  %v2012_v25 = vrot.slane %v1586_v43, 7  ;;  %v2682_v28 = vmax.f32 %v4015_v62, %v4700_v29 }
 0x1d5   :  { %v2042_v2 = vsel %vm1626_vm3, %v2040_v36, %v2041_v33  ;;  %v2069_v1 = vsel %vm1624_vm2, %v2068_v4, %v1617_v32  ;;  %v1985_v42 = vsel %vm1624_vm2, %v1984_v56, %v4474_v34  ;;  %v4774_v26 = vcombine.high %v4722_v0, %v5087_v38  ;;  %v2514_v43 = vpop.permute.xlu0 %2513 }
 0x1d6   :  { %v2043_v46 = vsel %vm1628_vm4, %v2040_v36, %v2042_v2  ;;  %v2070_v54 = vsel %vm1626_vm3, %v2068_v4, %v2069_v1  ;;  %v1986_v53 = vsel %vm1626_vm3, %v1984_v56, %v1985_v42  ;;  %v2013_v9 = vsel %vm1624_vm2, %v2012_v25, %v1585_v7  ;;  %v2540_v20 = vpop.permute.xlu1 %2539 }
 0x1d7   :  { %v2071_v32 = vsel %vm1628_vm4, %v2068_v4, %v2070_v54  ;;  %2565 = vrot.lane.b32.xlu0 %v4740_v3, %s3741_s0  ;;  %v2044_v62 = vsel %vm1630_vm5, %v2040_v36, %v2043_v46  ;;  %v1987_v29 = vsel %vm1628_vm4, %v1984_v56, %v1986_v53  ;;  %v2014_v33 = vsel %vm1626_vm3, %v2012_v25, %v2013_v9 }
 0x1d8   :  { %v2072_v34 = vsel %vm1630_vm5, %v2068_v4, %v2071_v32  ;;  %2583 = vrot.lane.b32.xlu1 %v4774_v26, %s3741_s0  ;;  %v2371_v7 = vcombine.low %v1981_v6, %v2009_v13  ;;  %v2690_v2 = vmax.f32 %v3991_v37, %v4660_v30  ;;  %v2681_v1 = vmax.f32 %v4004_v45, %v4670_v49 }
 0x1d9   :  { %v2015_v42 = vsel %vm1628_vm4, %v2012_v25, %v2014_v33  ;;  %v4792_v36 = vcombine.high %v4745_v52, %v5087_v38  ;;  %v4795_v4 = vrot.slane %v2380_v59, %v3844_v5  ;;  %v2781_v46 = vcombine.low %v2682_v28, %v2686_v21  ;;  %v2522_v49 = vpop.permute.xlu0 %2521 }
 0x1da   :  { %v2694_v54 = vmax.f32 %v4019_v17, %v2516_v11  ;;  %v2416_v53 = vcombine.low %v2044_v62, %v2072_v34  ;;  %v1988_v6 = vsel %vm1630_vm5, %v1984_v56, %v1987_v29  ;;  %v2016_v37 = vsel %vm1630_vm5, %v2012_v25, %v2015_v42  ;;  %v2532_v45 = vpop.permute.xlu1 %2531 }
 0x1db   :  { %v2685_v30 = vmax.f32 %v4055_v18, %v2498_v10  ;;  %2581 = vrot.lane.b32.xlu0 %v4792_v36, %s3741_s0  ;;  %v2689_v59 = vmax.f32 %v4050_v44, %v4725_v58  ;;  %v2693_v21 = vmax.f32 %v4080_v24, %v2514_v43  ;;  %v4809_v17 = vrot.slane %v2371_v7, %v3844_v5 }
 0x1dc   :  { %v2790_v13 = vcombine.low %v2690_v2, %v2694_v54  ;;  %2591 = vrot.lane.b32.xlu1 %v4795_v4, %s3741_s0  ;;  %v2702_v18 = vmax.f32 %v4121_v23, %v2532_v45  ;;  %v2407_v11 = vcombine.low %v1988_v6, %v2016_v37  ;;  %v4813_v10 = vrot.slane %v2781_v46, %v3844_v5 }
 0x1dd   :  { %v2745_v56 = vcombine.low %v2681_v1, %v2685_v30  ;;  %v2754_v28 = vcombine.low %v2689_v59, %v2693_v21  ;;  %v4817_v44 = vrot.slane %v2416_v53, %v3844_v5  ;;  %v2698_v24 = vmax.f32 %v4059_v22, %v4752_v61  ;;  %v2538_v9 = vpop.permute.xlu0 %2537 }
 0x1de   :  { %v2797_v25 = vrot.slane %v2790_v13, %v3844_v5  ;;  %v2548_v58 = vpop.permute.xlu1 %2547  ;;  %v2706_v62 = vmax.f32 %v4108_v16, %v2540_v20  ;;  %v4831_v22 = vrot.slane %v2407_v11, %v3844_v5  ;;  %v4835_v33 = vcombine.high %v4795_v4, %v5087_v38 }
 0x1df   :  { %2589 = vrot.lane.b32.xlu0 %v4809_v17, %s3741_s0  ;;  %v2752_v32 = vrot.slane %v2745_v56, %v3844_v5  ;;  %v2761_v43 = vrot.slane %v2754_v28, %v3844_v5  ;;  %v2799_v34 = vcombine.low %v2698_v24, %v2702_v18  ;;  %v2710_v29 = vmax.f32 %v4136_v15, %v2548_v58 }
 0x1e0   :  { %v3133_v23 = vcombine.low %v4813_v10, %v2797_v25  ;;  %2607 = vrot.lane.b32.xlu1 %v4817_v44, %s3741_s0  ;;  %v4846_v20 = vcombine.high %v4809_v17, %v5087_v38  ;;  %v2697_v42 = vmax.f32 %v4124_v8, %v2522_v49  ;;  %v4851_v54 = vcombine.high %v4817_v44, %v5087_v38 }
 0x1e1   :  { %v3041_v61 = vcombine.low %v2752_v32, %v2761_v43  ;;  %v2808_v7 = vcombine.low %v2706_v62, %v2710_v29  ;;  %v2530_v2 = vpop.permute.xlu0 %2529  ;;  %v2806_v16 = vrot.slane %v2799_v34, %v3844_v5  ;;  %v2705_v6 = vmax.f32 %v4152_v14, %v2538_v9 }
 0x1e2   :  { %v2701_v1 = vmax.f32 %v4161_v51, %v2530_v2  ;;  %v2556_v46 = vpop.permute.xlu1 %2555  ;;  %v4860_v8 = vrot.slane %v3133_v23, %v3839_v60  ;;  %v4867_v49 = vcombine.high %v4831_v22, %v5087_v38  ;;  %v3608_v24 = vcombine.high %v4813_v10, %v2797_v25 }
 0x1e3   :  { %2605 = vrot.lane.b32.xlu0 %v4831_v22, %s3741_s0  ;;  %v2815_v15 = vrot.slane %v2808_v7, %v3844_v5  ;;  %v4879_v23 = vrot.slane %v3041_v61, %v3839_v60  ;;  %v2714_v10 = vmax.f32 %v4157_v50, %v2556_v46 }
 0x1e4   :  { %2599 = vrot.lane.b32.xlu1 %v4835_v33, %s3741_s0  ;;  %v2763_v37 = vcombine.low %v2697_v42, %v2701_v1  ;;  %v3185_v7 = vrot.slane %v3608_v24, %v3839_v60 }
 0x1e5   :  { %v3134_v53 = vcombine.low %v2806_v16, %v2815_v15  ;;  %v2546_v51 = vpop.permute.xlu0 %2545  ;;  %v3609_v18 = vcombine.high %v2806_v16, %v2815_v15 }
 0x1e6   :  { %v2709_v30 = vmax.f32 %v4191_v41, %v2546_v51  ;;  %v3604_v41 = vcombine.high %v2752_v32, %v2761_v43  ;;  %v2770_v59 = vrot.slane %v2763_v37, %v3844_v5 }
 0x1e7   :  { %2597 = vrot.lane.b32.xlu0 %v4846_v20, %s3741_s0  ;;  %v4863_v45 = vrot.slane %v3134_v53, %v3839_v60  ;;  %v3192_v34 = vrot.slane %v3609_v18, %v3839_v60 }
 0x1e8   :  { %2615 = vrot.lane.b32.xlu1 %v4851_v54, %s3741_s0  ;;  %v2772_v13 = vcombine.low %v2705_v6, %v2709_v30  ;;  %v3093_v58 = vrot.slane %v3604_v41, %v3839_v60  ;;  %v5120_v41 = vld [vmem:[#allocation12_spill] sm:$0xff] }
 0x1e9   :  { %v3149_v14 = vcombine.low %v4860_v8, %v4863_v45  ;;  %v2572_v21 = vpop.permute.xlu1 %2571 }
 0x1ea   :  { %v2779_v56 = vrot.slane %v2772_v13, %v3844_v5  ;;  %v2722_v61 = vmax.f32 %v4219_v39, %v2572_v21  ;;  %v5121_v21 = vld [vmem:[#allocation14_spill] sm:$0xff] }
 0x1eb   :  { %2613 = vrot.lane.b32.xlu0 %v4867_v49, %s3741_s0 }
 0x1ec   :  { %v3042_v11 = vcombine.low %v2770_v59, %v2779_v56  ;;  %v3605_v28 = vcombine.high %v2770_v59, %v2779_v56 }
 0x1ed   :  { %v2564_v38 = vpop.permute.xlu1 %2563 }
 0x1ee   :  { %v3100_v9 = vrot.slane %v3605_v28, %v3839_v60  ;;  %v4882_v32 = vrot.slane %v3042_v11, %v3839_v60  ;;  %v2718_v43 = vmax.f32 %v4214_v12, %v2564_v38  ;;  %v3193_v12 = vcombine.low %v3185_v7, %v3192_v34  ;;  %v5122_v28 = vld [vmem:[#allocation16_spill] sm:$0xff]  ;;  %v5124_v34 = vld [vmem:[#allocation15_spill] sm:$0xff]  ;;  %v5125_v7 = vld [vmem:[#allocation18_spill] sm:$0xff] }
 0x1f0   :  { %v3101_v62 = vcombine.low %v3093_v58, %v3100_v9  ;;  %v3057_v29 = vcombine.low %v4879_v23, %v4882_v32  ;;  %v2925_v2 = vcombine.low %v2714_v10, %v2718_v43  ;;  %v2554_v1 = vpop.permute.xlu0 %2553  ;;  %v5123_v43 = vld [vmem:[#allocation13_spill] sm:$0xff] }
 0x1f1   :  { %v2580_v25 = vpop.permute.xlu1 %2579  ;;  %v2713_v39 = vmax.f32 %v4252_v48, %v2554_v1 }
 0x1f2   :  { %3119 = vrot.lane.b32.xlu0 %v3101_v62, %s3741_s0  ;;  %v2726_v16 = vmax.f32 %v4258_v35, %v2580_v25  ;;  %v2932_v42 = vrot.slane %v2925_v2, %v3844_v5 }
 0x1f4   :  { %v2934_v15 = vcombine.low %v2722_v61, %v2726_v16 }
 0x1f6   :  { %3211 = vrot.lane.b32.xlu0 %v3193_v12, %s3741_s0  ;;  %v2941_v53 = vrot.slane %v2934_v15, %v3844_v5  ;;  %v2570_v46 = vpop.permute.xlu0 %2569 }
 0x1f7   :  { %v2721_v35 = vmax.f32 %v5120_v41, %v2570_v46  ;;  %v5126_v46 = vld [vmem:[#allocation20_spill] sm:$0xff] }
 0x1f8   :  { %v3150_v50 = vcombine.low %v2932_v42, %v2941_v53 }
 0x1fa   :  { %v2588_v51 = vpop.permute.xlu1 %2587  ;;  %v2562_v6 = vpop.permute.xlu0 %2561  ;;  %v4911_v41 = vrot.slane %v3150_v50, %v3839_v60 }
 0x1fb   :  { %v2717_v37 = vmax.f32 %v4311_v19, %v2562_v6  ;;  %v2730_v19 = vmax.f32 %v5123_v43, %v2588_v51 }
 0x1fd   :  { %v2889_v59 = vcombine.low %v2713_v39, %v2717_v37  ;;  %v5127_v39 = vld [vmem:[#allocation17_spill] sm:$0xff] }
 0x1fe   :  { %v2604_v30 = vpop.permute.xlu1 %2603  ;;  %v2578_v13 = vpop.permute.xlu0 %2577 }
 0x1ff   :  { %v2725_v56 = vmax.f32 %v5121_v21, %v2578_v13  ;;  %v2896_v58 = vrot.slane %v2889_v59, %v3844_v5  ;;  %v2738_v10 = vmax.f32 %v5124_v34, %v2604_v30 }
 0x201   :  { %v2898_v18 = vcombine.low %v2721_v35, %v2725_v56  ;;  %v5128_v35 = vld [vmem:[#allocation19_spill] sm:$0xff]  ;;  %v5129_v56 = vld [vmem:[#allocation21_spill] sm:$0xff] }
 0x202   :  { %v2596_v11 = vpop.permute.xlu1 %2595  ;;  %v2586_v38 = vpop.permute.xlu0 %2585 }
 0x203   :  { %v2734_v24 = vmax.f32 %v5122_v28, %v2596_v11  ;;  %v2905_v9 = vrot.slane %v2898_v18, %v3844_v5  ;;  %v2729_v13 = vmax.f32 %v5127_v39, %v2586_v38 }
 0x205   :  { %v3058_v62 = vcombine.low %v2896_v58, %v2905_v9  ;;  %v2943_v25 = vcombine.low %v2730_v19, %v2734_v24  ;;  %v3606_v24 = vcombine.high %v2896_v58, %v2905_v9 }
 0x206   :  { %v2612_v48 = vpop.permute.xlu1 %2611  ;;  %v2602_v2 = vpop.permute.xlu0 %2601 }
 0x207   :  { %v2742_v61 = vmax.f32 %v5125_v7, %v2612_v48  ;;  %v2950_v16 = vrot.slane %v2943_v25, %v3844_v5  ;;  %v2737_v59 = vmax.f32 %v5128_v35, %v2602_v2  ;;  %v3110_v25 = vrot.slane %v3606_v24, %v3839_v60 }
 0x209   :  { %v2952_v1 = vcombine.low %v2738_v10, %v2742_v61  ;;  %v3610_v10 = vcombine.high %v2932_v42, %v2941_v53  ;;  %v4925_v61 = vrot.slane %v3058_v62, %v3839_v60 }
 0x20b   :  { %v2959_v12 = vrot.slane %v2952_v1, %v3844_v5  ;;  %v2594_v15 = vpop.permute.xlu0 %2593  ;;  %v3202_v42 = vrot.slane %v3610_v10, %v3839_v60 }
 0x20c   :  { %v2733_v6 = vmax.f32 %v5126_v46, %v2594_v15 }
 0x20d   :  { %v3151_v37 = vcombine.low %v2950_v16, %v2959_v12  ;;  %v3611_v50 = vcombine.high %v2950_v16, %v2959_v12 }
 0x20e   :  { %v2907_v21 = vcombine.low %v2729_v13, %v2733_v6 }
 0x20f   :  { %v2610_v51 = vpop.permute.xlu0 %2609  ;;  %v4914_v30 = vrot.slane %v3151_v37, %v3839_v60  ;;  %v3209_v9 = vrot.slane %v3611_v50, %v3839_v60 }
 0x210   :  { %v2741_v18 = vmax.f32 %v5129_v56, %v2610_v51  ;;  %v2914_v43 = vrot.slane %v2907_v21, %v3844_v5  ;;  %v2494_v19 = vpop.permute.xlu1 %2493 }
 0x211   :  { %v3166_v11 = vcombine.low %v4911_v41, %v4914_v30  ;;  %v3210_v53 = vcombine.low %v3202_v42, %v3209_v9  ;;  %v2683_v21 = vmax.f32 %v4433_v40, %v2494_v19 }
 0x212   :  { %v2916_v28 = vcombine.low %v2737_v59, %v2741_v18 }
 0x214   :  { %v2923_v38 = vrot.slane %v2916_v28, %v3844_v5  ;;  %v5130_v28 = vld [vmem:[#allocation22_spill] sm:$0xff] }
 0x216   :  { %v3059_v48 = vcombine.low %v2914_v43, %v2923_v38  ;;  %v3607_v34 = vcombine.high %v2914_v43, %v2923_v38  ;;  %v5131_v38 = vld [vmem:[#allocation24_spill] sm:$0xff] }
 0x218   :  { %v3117_v7 = vrot.slane %v3607_v34, %v3839_v60  ;;  %v4928_v2 = vrot.slane %v3059_v48, %v3839_v60 }
 0x21a   :  { %v3118_v58 = vcombine.low %v3110_v25, %v3117_v7  ;;  %v3074_v1 = vcombine.low %v4925_v61, %v4928_v2  ;;  %v2496_v16 = vpop.permute.xlu1 %2495 }
 0x21b   :  { %v2684_v6 = vmax.f32 %v4484_v63, %v2496_v16  ;;  %v5133_v16 = vld [vmem:[#allocation23_spill] sm:$0xff] }
 0x21c   :  { %3121 = vrot.lane.b32.xlu1 %v3118_v58, %s3741_s0  ;;  %v5132_v58 = vld [vmem:[#allocation26_spill] sm:$0xff] }
 0x21e   :  { %v2512_v12 = vpop.permute.xlu1 %2511 }
 0x21f   :  { %v2692_v51 = vmax.f32 %v4506_v27, %v2512_v12  ;;  %v5134_v12 = vld [vmem:[#allocation28_spill] sm:$0xff] }
 0x220   :  { %3213 = vrot.lane.b32.xlu1 %v3210_v53, %s3741_s0 }
 0x222   :  { %v2504_v15 = vpop.permute.xlu1 %2503 }
 0x223   :  { %v2510_v62 = vpop.permute.xlu0 %2509  ;;  %v2688_v46 = vmax.f32 %v4534_v57, %v2504_v15 }
 0x224   :  { %v2691_v24 = vmax.f32 %v5130_v28, %v2510_v62 }
 0x225   :  { %v2853_v35 = vcombine.low %v2684_v6, %v2688_v46  ;;  %v5135_v46 = vld [vmem:[#allocation27_spill] sm:$0xff] }
 0x226   :  { %v2520_v13 = vpop.permute.xlu1 %2519 }
 0x227   :  { %v2502_v37 = vpop.permute.xlu0 %2501  ;;  %v2696_v59 = vmax.f32 %v4551_v31, %v2520_v13  ;;  %v2860_v63 = vrot.slane %v2853_v35, %v3844_v5 }
 0x228   :  { %v2687_v39 = vmax.f32 %v4501_v47, %v2502_v37 }
 0x229   :  { %v2862_v56 = vcombine.low %v2692_v51, %v2696_v59  ;;  %v5137_v51 = vld [vmem:[#allocation25_spill] sm:$0xff] }
 0x22a   :  { %v2817_v43 = vcombine.low %v2683_v21, %v2687_v39  ;;  %v5136_v39 = vld [vmem:[#allocation30_spill] sm:$0xff] }
 0x22b   :  { %v2518_v18 = vpop.permute.xlu0 %2517  ;;  %v2528_v50 = vpop.permute.xlu1 %2527  ;;  %v2869_v47 = vrot.slane %v2862_v56, %v3844_v5  ;;  %v5138_v56 = vld [vmem:[#allocation29_spill] sm:$0xff] }
 0x22c   :  { %v2695_v57 = vmax.f32 %v5131_v38, %v2518_v18  ;;  %v2824_v10 = vrot.slane %v2817_v43, %v3844_v5  ;;  %v2700_v42 = vmax.f32 %v5133_v16, %v2528_v50 }
 0x22d   :  { %v3317_v34 = vcombine.low %v2860_v63, %v2869_v47 }
 0x22e   :  { %v2826_v48 = vcombine.low %v2691_v24, %v2695_v57  ;;  %v5139_v24 = vld [vmem:[#allocation31_spill] sm:$0xff] }
 0x22f   :  { %v2526_v27 = vpop.permute.xlu0 %2525 }
 0x230   :  { %v2833_v31 = vrot.slane %v2826_v48, %v3844_v5  ;;  %v2544_v40 = vpop.permute.xlu1 %2543  ;;  %v2699_v35 = vmax.f32 %v5137_v51, %v2526_v27 }
 0x231   :  { %v2708_v6 = vmax.f32 %v5135_v46, %v2544_v40 }
 0x232   :  { %v3225_v19 = vcombine.low %v2824_v10, %v2833_v31 }
 0x233   :  { %v2542_v25 = vpop.permute.xlu0 %2541 }
 0x234   :  { %v2536_v7 = vpop.permute.xlu1 %2535  ;;  %v2707_v18 = vmax.f32 %v5138_v56, %v2542_v25 }
 0x235   :  { %v2704_v9 = vmax.f32 %v5132_v58, %v2536_v7  ;;  %v3612_v58 = vcombine.high %v2824_v10, %v2833_v31 }
 0x237   :  { %v2534_v53 = vpop.permute.xlu0 %2533  ;;  %v2871_v37 = vcombine.low %v2700_v42, %v2704_v9  ;;  %v4961_v42 = vrot.slane %v3317_v34, %v3839_v60  ;;  %v3277_v31 = vrot.slane %v3612_v58, %v3839_v60 }
 0x238   :  { %v2703_v62 = vmax.f32 %v5134_v12, %v2534_v53  ;;  %v2552_v15 = vpop.permute.xlu1 %2551 }
 0x239   :  { %v2712_v13 = vmax.f32 %v5136_v39, %v2552_v15  ;;  %v2878_v57 = vrot.slane %v2871_v37, %v3844_v5  ;;  %v3616_v15 = vcombine.high %v2860_v63, %v2869_v47  ;;  %v4971_v39 = vrot.slane %v3225_v19, %v3839_v60 }
 0x23a   :  { %v2835_v28 = vcombine.low %v2699_v35, %v2703_v62  ;;  %v5140_v35 = vld [vmem:[#allocation32_spill] sm:$0xff] }
 0x23b   :  { %v2880_v59 = vcombine.low %v2708_v6, %v2712_v13  ;;  %v2550_v21 = vpop.permute.xlu0 %2549 }
 0x23c   :  { %v2711_v43 = vmax.f32 %v5139_v24, %v2550_v21  ;;  %v2560_v38 = vpop.permute.xlu1 %2559  ;;  %v2842_v9 = vrot.slane %v2835_v28, %v3844_v5 }
 0x23d   :  { %v2887_v50 = vrot.slane %v2880_v59, %v3844_v5  ;;  %v2716_v59 = vmax.f32 %v5140_v35, %v2560_v38 }
 0x23e   :  { %v2844_v48 = vcombine.low %v2707_v18, %v2711_v43  ;;  %v3369_v18 = vrot.slane %v3616_v15, %v3839_v60  ;;  %v5141_v43 = vld [vmem:[#allocation33_spill] sm:$0xff] }
 0x23f   :  { %v3318_v7 = vcombine.low %v2878_v57, %v2887_v50  ;;  %v2558_v40 = vpop.permute.xlu0 %2557  ;;  %v3617_v53 = vcombine.high %v2878_v57, %v2887_v50 }
 0x240   :  { %v2851_v27 = vrot.slane %v2844_v48, %v3844_v5  ;;  %v2576_v16 = vpop.permute.xlu1 %2575  ;;  %v2715_v57 = vmax.f32 %v5141_v43, %v2558_v40 }
 0x241   :  { %v4964_v25 = vrot.slane %v3318_v7, %v3839_v60  ;;  %v3376_v63 = vrot.slane %v3617_v53, %v3839_v60  ;;  %v2724_v28 = vmax.f32 %v4722_v0, %v2576_v16 }
 0x242   :  { %v3226_v12 = vcombine.low %v2842_v9, %v2851_v27  ;;  %v3613_v62 = vcombine.high %v2842_v9, %v2851_v27 }
 0x243   :  { %v3333_v6 = vcombine.low %v4961_v42, %v4964_v25  ;;  %v3377_v50 = vcombine.low %v3369_v18, %v3376_v63 }
 0x244   :  { %v2568_v10 = vpop.permute.xlu1 %2567  ;;  %v3284_v37 = vrot.slane %v3613_v62, %v3839_v60  ;;  %v4974_v34 = vrot.slane %v3226_v12, %v3839_v60 }
 0x245   :  { %v2574_v46 = vpop.permute.xlu0 %2573  ;;  %v2720_v13 = vmax.f32 %v4732_v55, %v2568_v10 }
 0x246   :  { %v3285_v51 = vcombine.low %v3277_v31, %v3284_v37  ;;  %v3241_v47 = vcombine.low %v4971_v39, %v4974_v34  ;;  %v2723_v38 = vmax.f32 %v4745_v52, %v2574_v46 }
 0x247   :  { %v2997_v24 = vcombine.low %v2716_v59, %v2720_v13 }
 0x248   :  { %3303 = vrot.lane.b32.xlu0 %v3285_v51, %s3741_s0 }
 0x249   :  { %v2566_v21 = vpop.permute.xlu0 %2565  ;;  %v3004_v27 = vrot.slane %v2997_v24, %v3844_v5 }
 0x24a   :  { %v2719_v56 = vmax.f32 %v4740_v3, %v2566_v21  ;;  %v2584_v19 = vpop.permute.xlu1 %2583 }
 0x24b   :  { %v2728_v55 = vmax.f32 %v4774_v26, %v2584_v19 }
 0x24c   :  { %v2961_v58 = vcombine.low %v2715_v57, %v2719_v56  ;;  %3395 = vrot.lane.b32.xlu0 %v3377_v50, %s3741_s0 }
 0x24d   :  { %v3006_v48 = vcombine.low %v2724_v28, %v2728_v55  ;;  %v2582_v7 = vpop.permute.xlu0 %2581 }
 0x24e   :  { %v2727_v3 = vmax.f32 %v4792_v36, %v2582_v7  ;;  %v2592_v9 = vpop.permute.xlu1 %2591  ;;  %v2968_v40 = vrot.slane %v2961_v58, %v3844_v5 }
 0x24f   :  { %v3013_v0 = vrot.slane %v3006_v48, %v3844_v5  ;;  %v2732_v10 = vmax.f32 %v4795_v4, %v2592_v9 }
 0x250   :  { %v2970_v16 = vcombine.low %v2723_v38, %v2727_v3 }
 0x251   :  { %v3334_v53 = vcombine.low %v3004_v27, %v3013_v0  ;;  %v2590_v26 = vpop.permute.xlu0 %2589 }
 0x252   :  { %v2977_v12 = vrot.slane %v2970_v16, %v3844_v5  ;;  %v2608_v62 = vpop.permute.xlu1 %2607  ;;  %v2731_v59 = vmax.f32 %v4809_v17, %v2590_v26 }
 0x253   :  { %v2740_v51 = vmax.f32 %v4817_v44, %v2608_v62  ;;  %v3342_v17 = vrot.slane %v3334_v53, %v3839_v60 }
 0x254   :  { %v3242_v15 = vcombine.low %v2968_v40, %v2977_v12  ;;  %v3614_v24 = vcombine.high %v2968_v40, %v2977_v12 }
 0x255   :  { %v2606_v52 = vpop.permute.xlu0 %2605 }
 0x256   :  { %v2600_v46 = vpop.permute.xlu1 %2599  ;;  %v2739_v19 = vmax.f32 %v4831_v22, %v2606_v52  ;;  %v3294_v48 = vrot.slane %v3614_v24, %v3839_v60  ;;  %v3250_v3 = vrot.slane %v3242_v15, %v3839_v60 }
 0x257   :  { %v2736_v36 = vmax.f32 %v4835_v33, %v2600_v46 }
 0x259   :  { %v2598_v31 = vpop.permute.xlu0 %2597  ;;  %v3015_v63 = vcombine.low %v2732_v10, %v2736_v36 }
 0x25a   :  { %v2735_v37 = vmax.f32 %v4846_v20, %v2598_v31  ;;  %v2616_v13 = vpop.permute.xlu1 %2615 }
 0x25b   :  { %v2744_v35 = vmax.f32 %v4851_v54, %v2616_v13  ;;  %v3022_v4 = vrot.slane %v3015_v63, %v3844_v5 }
 0x25c   :  { %v2979_v18 = vcombine.low %v2731_v59, %v2735_v37 }
 0x25d   :  { %v3024_v21 = vcombine.low %v2740_v51, %v2744_v35  ;;  %v2614_v56 = vpop.permute.xlu0 %2613 }
 0x25e   :  { %v2743_v33 = vmax.f32 %v4867_v49, %v2614_v56  ;;  %v2986_v44 = vrot.slane %v2979_v18, %v3844_v5  ;;  %v3618_v49 = vcombine.high %v3004_v27, %v3013_v0 }
 0x25f   :  { %v3031_v28 = vrot.slane %v3024_v21, %v3844_v5 }
 0x260   :  { %v2988_v20 = vcombine.low %v2739_v19, %v2743_v33  ;;  %v3386_v40 = vrot.slane %v3618_v49, %v3839_v60 }
 0x261   :  { %v3335_v55 = vcombine.low %v3022_v4, %v3031_v28  ;;  %v3619_v22 = vcombine.high %v3022_v4, %v3031_v28 }
 0x262   :  { %v2995_v54 = vrot.slane %v2988_v20, %v3844_v5 }
 0x263   :  { %v3349_v43 = vrot.slane %v3335_v55, %v3839_v60  ;;  %v3393_v26 = vrot.slane %v3619_v22, %v3839_v60 }
 0x264   :  { %v3243_v57 = vcombine.low %v2986_v44, %v2995_v54  ;;  %v3615_v50 = vcombine.high %v2986_v44, %v2995_v54  ;;  %v3120_v7 = vpop.permute.xlu0 %3119 }
 0x265   :  { %v3350_v38 = vcombine.low %v3342_v17, %v3349_v43  ;;  %v3402_v5 = vsel %vm3401_vm6, %v3057_v29, %v3120_v7  ;;  %v3394_v29 = vcombine.low %v3386_v40, %v3393_v26 }
 0x266   :  { %v3301_v58 = vrot.slane %v3615_v50, %v3839_v60  ;;  %v3257_v9 = vrot.slane %v3243_v57, %v3839_v60  ;;  %v3410_v16 = vmax.f32 %v3402_v5, 0.0 }
 0x268   :  { %v3302_v53 = vcombine.low %v3294_v48, %v3301_v58  ;;  %v3258_v27 = vcombine.low %v3250_v3, %v3257_v9  ;;  %3418 = vst [vmem:[#allocation8] sm:$0xff] %v3410_v16  ;;  %v3212_v0 = vpop.permute.xlu0 %3211 }
 0x269   :  { %v3404_v23 = vsel %vm3401_vm6, %v3149_v14, %v3212_v0 }
 0x26a   :  { %3305 = vrot.lane.b32.xlu1 %v3302_v53, %s3741_s0  ;;  %v3411_v32 = vmax.f32 %v3404_v23, 0.0 }
 0x26c   :  { %3419 = vst [vmem:[#allocation8 + $0x8] sm:$0xff] %v3411_v32 }
 0x26e   :  { %3397 = vrot.lane.b32.xlu1 %v3394_v29, %s3741_s0 }
 0x28e   :  { %v3122_v12 = vpop.permute.xlu1 %3121 }
 0x28f   :  { %v3403_v62 = vsel %vm3401_vm6, %v3074_v1, %v3122_v12 }
 0x290   :  { %v3414_v15 = vmax.f32 %v3403_v62, 0.0 }
 0x292   :  { %3422 = vst [vmem:[#allocation8 + $0x20] sm:$0xff] %v3414_v15  ;;  %v3214_v52 = vpop.permute.xlu1 %3213 }
 0x293   :  { %v3405_v60 = vsel %vm3401_vm6, %v3166_v11, %v3214_v52 }
 0x294   :  { %v3415_v8 = vmax.f32 %v3405_v60, 0.0 }
 0x296   :  { %3423 = vst [vmem:[#allocation8 + $0x28] sm:$0xff] %v3415_v8 }
 0x2ba   :  { %v3304_v45 = vpop.permute.xlu0 %3303 }
 0x2bb   :  { %v3406_v14 = vsel %vm3401_vm6, %v3241_v47, %v3304_v45 }
 0x2bc   :  { %v3412_v46 = vmax.f32 %v3406_v14, 0.0 }
 0x2be   :  { %3420 = vst [vmem:[#allocation8 + $0x10] sm:$0xff] %v3412_v46  ;;  %v3396_v61 = vpop.permute.xlu0 %3395 }
 0x2bf   :  { %v3408_v2 = vsel %vm3401_vm6, %v3333_v6, %v3396_v61 }
 0x2c0   :  { %v3413_v1 = vmax.f32 %v3408_v2, 0.0 }
 0x2c2   :  { %3421 = vst [vmem:[#allocation8 + $0x18] sm:$0xff] %v3413_v1 }
 0x2dc   :  { %v3306_v41 = vpop.permute.xlu1 %3305 }
 0x2dd   :  { %v3407_v30 = vsel %vm3401_vm6, %v3258_v27, %v3306_v41 }
 0x2de   :  { %v3416_v11 = vmax.f32 %v3407_v30, 0.0 }
 0x2e0   :  { %3424 = vst [vmem:[#allocation8 + $0x30] sm:$0xff] %v3416_v11  ;;  %v3398_v39 = vpop.permute.xlu1 %3397 }
 0x2e1   :  { %v3409_v34 = vsel %vm3401_vm6, %v3350_v38, %v3398_v39 }
 0x2e2   :  { %v3417_v47 = vmax.f32 %v3409_v34, 0.0 }
 0x2e4   :  { %3425 = vst [vmem:[#allocation8 + $0x38] sm:$0xff] %v3417_v47 }
 0x2e5   :  { %3717 = shalt.err (!%p3714_p5)
}
 0x2e6   :  { %3437 = dma.vmem_to_hbm [thread:$0]  %s3432_s30, 1024, %s5051_s3, [#allocation4], %s3733_s15, %s3733_s15, %s3734_s16  }
 0x2e7   :  { %3730 = dma.done.wait [#allocation4], 1024  }
 0x2e8   :  { %3731 = vsyncadd [#allocation4], 4294966272 }
 0x2e9   :  { %3441 = vsyncpa [#allocation3], 1 }
 0x2ea   :  { %3442 = vsyncpa [#allocation6], 1 }
 0x2eb   :  { %3443 = vsyncpa [#allocation4], 1 }

</bundles_post_ra>
